<compile_context>
chip_gen: v7x
topology: tpu7x:2x2x1
jax: 0.10.0
libtpu: 0.0.40
codegen_flags: <defaults>
</compile_context>

<pallas_src>
import functools

import jax
import jax.numpy as jnp
from jax.experimental import pallas as pl
from jax.experimental.pallas import tpu as pltpu  # noqa: F401  (TPU backend assumed)

B_PAD = 8     # pad batch (sublane) dim to a multiple of 8
LANE = 128    # pad fc output lanes to 128 for an unmasked final store


# ------------------------------ Fused kernel ---------------------------------
def fused_lstm_kernel(x_ref, wih0_ref, whh0_ref, b0_ref,
                      wih1_ref, whh1_ref, b1_ref,
                      fcw_ref, fcb_ref, out_ref):
    """Both LSTM layers + fc head, whole sequence, single kernel invocation.

    x_ref   : (T*Bp, D)   time-major inputs, flattened (t major, batch minor)
    wih0_ref: (D, 4H)     layer-0 W_ih^T     (gate order i, f, g, o)
    whh0_ref: (H, 4H)     layer-0 W_hh^T
    b0_ref  : (1, 4H)     layer-0 combined bias (b_ih + b_hh)
    wih1_ref: (H, 4H)     layer-1 W_ih^T
    whh1_ref: (H, 4H)     layer-1 W_hh^T
    b1_ref  : (1, 4H)
    fcw_ref : (H, LANE)   fc weight^T, zero-padded to 128 output lanes
    fcb_ref : (1, LANE)
    out_ref : (Bp, LANE)  logits (lane-dense store, the only HBM write)
    """
    TB, _D = x_ref.shape
    Bp = out_ref.shape[0]
    T = TB // Bp
    H = whh0_ref.shape[0]

    # Whole-sequence layer-0 input projection: one big MXU matmul, hoisted off
    # the recurrent critical path.  (b_ih0 + b_hh0) folded in here.
    xproj = (jnp.dot(x_ref[...], wih0_ref[...],
                     preferred_element_type=jnp.float32)
             + b0_ref[...])                                        # (T*Bp, 4H)

    whh0 = whh0_ref[...]
    wih1 = wih1_ref[...]
    whh1 = whh1_ref[...]
    b1 = b1_ref[...]

    def gates_to_hc(gates, c):
        # Two full-width EUP passes over the (Bp, 4H=128) vreg, then lane slices.
        sg = jax.nn.sigmoid(gates)
        tg = jnp.tanh(gates)
        i_g = sg[:, 0 * H:1 * H]
        f_g = sg[:, 1 * H:2 * H]
        g_g = tg[:, 2 * H:3 * H]
        o_g = sg[:, 3 * H:4 * H]
        c_new = f_g * c + i_g * g_g
        h_new = o_g * jnp.tanh(c_new)
        return h_new, c_new

    z = jnp.zeros((Bp, H), jnp.float32)
    h0, c0, h1, c1 = z, z, z, z
    # Static unroll over timesteps: T is a trace-time constant and small, so
    # all slices below are static (no dynamic VMEM indexing, no scratch).
    for t in range(T):
        g0 = xproj[t * Bp:(t + 1) * Bp, :] + jnp.dot(
            h0, whh0, preferred_element_type=jnp.float32)
        h0, c0 = gates_to_hc(g0, c0)
        g1 = (jnp.dot(h0, wih1, preferred_element_type=jnp.float32)
              + jnp.dot(h1, whh1, preferred_element_type=jnp.float32)
              + b1)
        h1, c1 = gates_to_hc(g1, c1)

    # fc head fused in: single lane-dense (Bp, 128) store at the very end.
    out_ref[...] = (
        jnp.dot(h1, fcw_ref[...], preferred_element_type=jnp.float32)
        + fcb_ref[...]
    )


# --------------------------------- Full model ---------------------------------
@functools.partial(jax.jit, static_argnums=(2,))
def lstm_model_forward(token_ids, params, num_classes):
    """Equivalent of LSTM.forward in eval mode.

    token_ids: (B, T) int32  ->  (B*?, num_classes) float32  (PyTorch .view(-1, 2))
    """
    B, T = token_ids.shape
    Bp = ((B + B_PAD - 1) // B_PAD) * B_PAD

    # Embedding lookup — irregular gather, kept as plain-JAX glue.
    emb = jnp.take(params["embedding"], token_ids, axis=0)        # (B, T, D)
    x = jnp.transpose(emb, (1, 0, 2)).astype(jnp.float32)          # (T, B, D)
    x = jnp.pad(x, ((0, 0), (0, Bp - B), (0, 0)))                  # (T, Bp, D)
    x = x.reshape(T * Bp, -1)                                      # (T*Bp, D)

    # TODO(synk): nn.LSTM dropout=0.5 between layers is train-only; this
    # implements eval/inference semantics (no dropout).
    logits_pad = pl.pallas_call(
        fused_lstm_kernel,
        out_shape=jax.ShapeDtypeStruct((Bp, LANE), jnp.float32),
    )(x, params["w_ih0"], params["w_hh0"], params["b0"],
      params["w_ih1"], params["w_hh1"], params["b1"],
      params["fc_w_pad"], params["fc_b_pad"])

    # out[:, -1, :] -> fc -> .squeeze(0).view(-1, 2)
    return logits_pad[:B, :num_classes].reshape(-1, num_classes)


# ----------------------------- Param initialization ---------------------------
def init_params(key, vocab_size, embedding_dim, hidden_size, num_classes):
    D, H, C = embedding_dim, hidden_size, num_classes
    ks = jax.random.split(key, 12)
    stdv = 1.0 / jnp.sqrt(jnp.float32(H))

    def u(k, shape):
        return jax.random.uniform(k, shape, jnp.float32, -stdv, stdv)

    # PyTorch layouts: w_ih_l* (4H, in), w_hh_l* (4H, H), gate order i,f,g,o.
    w_ih_l0 = u(ks[1], (4 * H, D))
    w_hh_l0 = u(ks[2], (4 * H, H))
    b_l0 = u(ks[3], (4 * H,)) + u(ks[4], (4 * H,))
    w_ih_l1 = u(ks[5], (4 * H, H))
    w_hh_l1 = u(ks[6], (4 * H, H))
    b_l1 = u(ks[7], (4 * H,)) + u(ks[8], (4 * H,))
    fc_w = u(ks[9], (C, H))
    fc_b = u(ks[10], (C,))

    return {
        # nn.Embedding default init ~ N(0, 1)
        "embedding": jax.random.normal(ks[0], (vocab_size, D), jnp.float32),
        # Transposed weights so every in-kernel matmul is plain row-major @:
        "w_ih0": w_ih_l0.T,                   # (D, 4H)
        "w_hh0": w_hh_l0.T,                   # (H, 4H)
        "b0": b_l0.reshape(1, 4 * H),
        "w_ih1": w_ih_l1.T,                   # (H, 4H)
        "w_hh1": w_hh_l1.T,                   # (H, 4H)
        "b1": b_l1.reshape(1, 4 * H),
        # fc padded to 128 output lanes so the kernel's only store is unmasked
        "fc_w_pad": jnp.pad(fc_w.T, ((0, 0), (0, LANE - C))),
        "fc_b_pad": jnp.pad(fc_b, (0, LANE - C)).reshape(1, LANE),
    }


if __name__ == "__main__":
    VOCAB, EMB_DIM, HIDDEN, NUM_CLASSES = 50, 32, 32, 2
    B, T = 2, 8

    key = jax.random.PRNGKey(0)
    k_param, k_tok = jax.random.split(key)
    params = init_params(k_param, VOCAB, EMB_DIM, HIDDEN, NUM_CLASSES)
    token_ids = jax.random.randint(k_tok, (B, T), 0, VOCAB, dtype=jnp.int32)

    out = lstm_model_forward(token_ids, params, NUM_CLASSES)
    out = jax.block_until_ready(out)
    assert out.shape == (B, NUM_CLASSES), out.shape
    print("KERNEL_OK")
</pallas_src>

<mosaic_0001>
module attributes {stable_mosaic.version = 11 : i64} {
  func.func @fused_lstm_kernel(%arg0: memref<64x32xf32, #tpu.memory_space<vmem>>, %arg1: memref<32x128xf32, #tpu.memory_space<vmem>>, %arg2: memref<32x128xf32, #tpu.memory_space<vmem>>, %arg3: memref<1x128xf32, #tpu.memory_space<vmem>>, %arg4: memref<32x128xf32, #tpu.memory_space<vmem>>, %arg5: memref<32x128xf32, #tpu.memory_space<vmem>>, %arg6: memref<1x128xf32, #tpu.memory_space<vmem>>, %arg7: memref<32x128xf32, #tpu.memory_space<vmem>>, %arg8: memref<1x128xf32, #tpu.memory_space<vmem>>, %arg9: memref<8x128xf32, #tpu.memory_space<vmem>>) attributes {dimension_semantics = [], scalar_prefetch = 0 : i64, scratch_operands = 0 : i64, tpu.core_type = #tpu.core_type<tc>} {
    %c0 = arith.constant 0 : index
    %c0_0 = arith.constant 0 : index
    %0 = vector.load %arg0[%c0, %c0_0] : memref<64x32xf32, #tpu.memory_space<vmem>>, vector<64x32xf32>
    %c0_1 = arith.constant 0 : index
    %c0_2 = arith.constant 0 : index
    %1 = vector.load %arg1[%c0_1, %c0_2] : memref<32x128xf32, #tpu.memory_space<vmem>>, vector<32x128xf32>
    %cst = arith.constant dense<0.000000e+00> : vector<64x128xf32>
    %2 = tpu.matmul %0, %1, %cst {dimension_numbers = #tpu.dot_dimension_numbers<[1], [0], [0], [1], [0, 0, 1, 1], [], []>} : vector<64x32xf32>, vector<32x128xf32>, vector<64x128xf32> -> vector<64x128xf32>
    %c0_3 = arith.constant 0 : index
    %c0_4 = arith.constant 0 : index
    %3 = vector.load %arg3[%c0_3, %c0_4] : memref<1x128xf32, #tpu.memory_space<vmem>>, vector<1x128xf32>
    %4 = vector.broadcast %3 : vector<1x128xf32> to vector<64x128xf32>
    %5 = arith.addf %2, %4 : vector<64x128xf32>
    %c0_5 = arith.constant 0 : index
    %c0_6 = arith.constant 0 : index
    %6 = vector.load %arg2[%c0_5, %c0_6] : memref<32x128xf32, #tpu.memory_space<vmem>>, vector<32x128xf32>
    %c0_7 = arith.constant 0 : index
    %c0_8 = arith.constant 0 : index
    %7 = vector.load %arg4[%c0_7, %c0_8] : memref<32x128xf32, #tpu.memory_space<vmem>>, vector<32x128xf32>
    %c0_9 = arith.constant 0 : index
    %c0_10 = arith.constant 0 : index
    %8 = vector.load %arg5[%c0_9, %c0_10] : memref<32x128xf32, #tpu.memory_space<vmem>>, vector<32x128xf32>
    %c0_11 = arith.constant 0 : index
    %c0_12 = arith.constant 0 : index
    %9 = vector.load %arg6[%c0_11, %c0_12] : memref<1x128xf32, #tpu.memory_space<vmem>>, vector<1x128xf32>
    %cst_13 = arith.constant 0.000000e+00 : f32
    %10 = vector.broadcast %cst_13 : f32 to vector<8x32xf32>
    %11 = vector.extract_strided_slice %5 {offsets = [0, 0], sizes = [8, 128], strides = [1, 1]} : vector<64x128xf32> to vector<8x128xf32>
    %cst_14 = arith.constant dense<0.000000e+00> : vector<8x128xf32>
    %12 = tpu.matmul %10, %6, %cst_14 {dimension_numbers = #tpu.dot_dimension_numbers<[1], [0], [0], [1], [0, 0, 1, 1], [], []>} : vector<8x32xf32>, vector<32x128xf32>, vector<8x128xf32> -> vector<8x128xf32>
    %13 = arith.addf %11, %12 : vector<8x128xf32>
    %14 = arith.negf %13 : vector<8x128xf32>
    %15 = math.exp %14 : vector<8x128xf32>
    %cst_15 = arith.constant 1.000000e+00 : f32
    %16 = vector.broadcast %cst_15 : f32 to vector<8x128xf32>
    %17 = arith.addf %16, %15 : vector<8x128xf32>
    %18 = arith.divf %16, %17 : vector<8x128xf32>
    %19 = math.tanh %13 : vector<8x128xf32>
    %20 = vector.extract_strided_slice %18 {offsets = [0, 0], sizes = [8, 32], strides = [1, 1]} : vector<8x128xf32> to vector<8x32xf32>
    %21 = vector.extract_strided_slice %18 {offsets = [0, 32], sizes = [8, 32], strides = [1, 1]} : vector<8x128xf32> to vector<8x32xf32>
    %22 = vector.extract_strided_slice %19 {offsets = [0, 64], sizes = [8, 32], strides = [1, 1]} : vector<8x128xf32> to vector<8x32xf32>
    %23 = vector.extract_strided_slice %18 {offsets = [0, 96], sizes = [8, 32], strides = [1, 1]} : vector<8x128xf32> to vector<8x32xf32>
    %24 = arith.mulf %21, %10 : vector<8x32xf32>
    %25 = arith.mulf %20, %22 : vector<8x32xf32>
    %26 = arith.addf %24, %25 : vector<8x32xf32>
    %27 = math.tanh %26 : vector<8x32xf32>
    %28 = arith.mulf %23, %27 : vector<8x32xf32>
    %cst_16 = arith.constant dense<0.000000e+00> : vector<8x128xf32>
    %29 = tpu.matmul %28, %7, %cst_16 {dimension_numbers = #tpu.dot_dimension_numbers<[1], [0], [0], [1], [0, 0, 1, 1], [], []>} : vector<8x32xf32>, vector<32x128xf32>, vector<8x128xf32> -> vector<8x128xf32>
    %cst_17 = arith.constant dense<0.000000e+00> : vector<8x128xf32>
    %30 = tpu.matmul %10, %8, %cst_17 {dimension_numbers = #tpu.dot_dimension_numbers<[1], [0], [0], [1], [0, 0, 1, 1], [], []>} : vector<8x32xf32>, vector<32x128xf32>, vector<8x128xf32> -> vector<8x128xf32>
    %31 = arith.addf %29, %30 : vector<8x128xf32>
    %32 = vector.broadcast %9 : vector<1x128xf32> to vector<8x128xf32>
    %33 = arith.addf %31, %32 : vector<8x128xf32>
    %34 = arith.negf %33 : vector<8x128xf32>
    %35 = math.exp %34 : vector<8x128xf32>
    %cst_18 = arith.constant 1.000000e+00 : f32
    %36 = vector.broadcast %cst_18 : f32 to vector<8x128xf32>
    %37 = arith.addf %36, %35 : vector<8x128xf32>
    %38 = arith.divf %36, %37 : vector<8x128xf32>
    %39 = math.tanh %33 : vector<8x128xf32>
    %40 = vector.extract_strided_slice %38 {offsets = [0, 0], sizes = [8, 32], strides = [1, 1]} : vector<8x128xf32> to vector<8x32xf32>
    %41 = vector.extract_strided_slice %38 {offsets = [0, 32], sizes = [8, 32], strides = [1, 1]} : vector<8x128xf32> to vector<8x32xf32>
    %42 = vector.extract_strided_slice %39 {offsets = [0, 64], sizes = [8, 32], strides = [1, 1]} : vector<8x128xf32> to vector<8x32xf32>
    %43 = vector.extract_strided_slice %38 {offsets = [0, 96], sizes = [8, 32], strides = [1, 1]} : vector<8x128xf32> to vector<8x32xf32>
    %44 = arith.mulf %41, %10 : vector<8x32xf32>
    %45 = arith.mulf %40, %42 : vector<8x32xf32>
    %46 = arith.addf %44, %45 : vector<8x32xf32>
    %47 = math.tanh %46 : vector<8x32xf32>
    %48 = arith.mulf %43, %47 : vector<8x32xf32>
    %49 = vector.extract_strided_slice %5 {offsets = [8, 0], sizes = [8, 128], strides = [1, 1]} : vector<64x128xf32> to vector<8x128xf32>
    %cst_19 = arith.constant dense<0.000000e+00> : vector<8x128xf32>
    %50 = tpu.matmul %28, %6, %cst_19 {dimension_numbers = #tpu.dot_dimension_numbers<[1], [0], [0], [1], [0, 0, 1, 1], [], []>} : vector<8x32xf32>, vector<32x128xf32>, vector<8x128xf32> -> vector<8x128xf32>
    %51 = arith.addf %49, %50 : vector<8x128xf32>
    %52 = arith.negf %51 : vector<8x128xf32>
    %53 = math.exp %52 : vector<8x128xf32>
    %cst_20 = arith.constant 1.000000e+00 : f32
    %54 = vector.broadcast %cst_20 : f32 to vector<8x128xf32>
    %55 = arith.addf %54, %53 : vector<8x128xf32>
    %56 = arith.divf %54, %55 : vector<8x128xf32>
    %57 = math.tanh %51 : vector<8x128xf32>
    %58 = vector.extract_strided_slice %56 {offsets = [0, 0], sizes = [8, 32], strides = [1, 1]} : vector<8x128xf32> to vector<8x32xf32>
    %59 = vector.extract_strided_slice %56 {offsets = [0, 32], sizes = [8, 32], strides = [1, 1]} : vector<8x128xf32> to vector<8x32xf32>
    %60 = vector.extract_strided_slice %57 {offsets = [0, 64], sizes = [8, 32], strides = [1, 1]} : vector<8x128xf32> to vector<8x32xf32>
    %61 = vector.extract_strided_slice %56 {offsets = [0, 96], sizes = [8, 32], strides = [1, 1]} : vector<8x128xf32> to vector<8x32xf32>
    %62 = arith.mulf %59, %26 : vector<8x32xf32>
    %63 = arith.mulf %58, %60 : vector<8x32xf32>
    %64 = arith.addf %62, %63 : vector<8x32xf32>
    %65 = math.tanh %64 : vector<8x32xf32>
    %66 = arith.mulf %61, %65 : vector<8x32xf32>
    %cst_21 = arith.constant dense<0.000000e+00> : vector<8x128xf32>
    %67 = tpu.matmul %66, %7, %cst_21 {dimension_numbers = #tpu.dot_dimension_numbers<[1], [0], [0], [1], [0, 0, 1, 1], [], []>} : vector<8x32xf32>, vector<32x128xf32>, vector<8x128xf32> -> vector<8x128xf32>
    %cst_22 = arith.constant dense<0.000000e+00> : vector<8x128xf32>
    %68 = tpu.matmul %48, %8, %cst_22 {dimension_numbers = #tpu.dot_dimension_numbers<[1], [0], [0], [1], [0, 0, 1, 1], [], []>} : vector<8x32xf32>, vector<32x128xf32>, vector<8x128xf32> -> vector<8x128xf32>
    %69 = arith.addf %67, %68 : vector<8x128xf32>
    %70 = vector.broadcast %9 : vector<1x128xf32> to vector<8x128xf32>
    %71 = arith.addf %69, %70 : vector<8x128xf32>
    %72 = arith.negf %71 : vector<8x128xf32>
    %73 = math.exp %72 : vector<8x128xf32>
    %cst_23 = arith.constant 1.000000e+00 : f32
    %74 = vector.broadcast %cst_23 : f32 to vector<8x128xf32>
    %75 = arith.addf %74, %73 : vector<8x128xf32>
    %76 = arith.divf %74, %75 : vector<8x128xf32>
    %77 = math.tanh %71 : vector<8x128xf32>
    %78 = vector.extract_strided_slice %76 {offsets = [0, 0], sizes = [8, 32], strides = [1, 1]} : vector<8x128xf32> to vector<8x32xf32>
    %79 = vector.extract_strided_slice %76 {offsets = [0, 32], sizes = [8, 32], strides = [1, 1]} : vector<8x128xf32> to vector<8x32xf32>
    %80 = vector.extract_strided_slice %77 {offsets = [0, 64], sizes = [8, 32], strides = [1, 1]} : vector<8x128xf32> to vector<8x32xf32>
    %81 = vector.extract_strided_slice %76 {offsets = [0, 96], sizes = [8, 32], strides = [1, 1]} : vector<8x128xf32> to vector<8x32xf32>
    %82 = arith.mulf %79, %46 : vector<8x32xf32>
    %83 = arith.mulf %78, %80 : vector<8x32xf32>
    %84 = arith.addf %82, %83 : vector<8x32xf32>
    %85 = math.tanh %84 : vector<8x32xf32>
    %86 = arith.mulf %81, %85 : vector<8x32xf32>
    %87 = vector.extract_strided_slice %5 {offsets = [16, 0], sizes = [8, 128], strides = [1, 1]} : vector<64x128xf32> to vector<8x128xf32>
    %cst_24 = arith.constant dense<0.000000e+00> : vector<8x128xf32>
    %88 = tpu.matmul %66, %6, %cst_24 {dimension_numbers = #tpu.dot_dimension_numbers<[1], [0], [0], [1], [0, 0, 1, 1], [], []>} : vector<8x32xf32>, vector<32x128xf32>, vector<8x128xf32> -> vector<8x128xf32>
    %89 = arith.addf %87, %88 : vector<8x128xf32>
    %90 = arith.negf %89 : vector<8x128xf32>
    %91 = math.exp %90 : vector<8x128xf32>
    %cst_25 = arith.constant 1.000000e+00 : f32
    %92 = vector.broadcast %cst_25 : f32 to vector<8x128xf32>
    %93 = arith.addf %92, %91 : vector<8x128xf32>
    %94 = arith.divf %92, %93 : vector<8x128xf32>
    %95 = math.tanh %89 : vector<8x128xf32>
    %96 = vector.extract_strided_slice %94 {offsets = [0, 0], sizes = [8, 32], strides = [1, 1]} : vector<8x128xf32> to vector<8x32xf32>
    %97 = vector.extract_strided_slice %94 {offsets = [0, 32], sizes = [8, 32], strides = [1, 1]} : vector<8x128xf32> to vector<8x32xf32>
    %98 = vector.extract_strided_slice %95 {offsets = [0, 64], sizes = [8, 32], strides = [1, 1]} : vector<8x128xf32> to vector<8x32xf32>
    %99 = vector.extract_strided_slice %94 {offsets = [0, 96], sizes = [8, 32], strides = [1, 1]} : vector<8x128xf32> to vector<8x32xf32>
    %100 = arith.mulf %97, %64 : vector<8x32xf32>
    %101 = arith.mulf %96, %98 : vector<8x32xf32>
    %102 = arith.addf %100, %101 : vector<8x32xf32>
    %103 = math.tanh %102 : vector<8x32xf32>
    %104 = arith.mulf %99, %103 : vector<8x32xf32>
    %cst_26 = arith.constant dense<0.000000e+00> : vector<8x128xf32>
    %105 = tpu.matmul %104, %7, %cst_26 {dimension_numbers = #tpu.dot_dimension_numbers<[1], [0], [0], [1], [0, 0, 1, 1], [], []>} : vector<8x32xf32>, vector<32x128xf32>, vector<8x128xf32> -> vector<8x128xf32>
    %cst_27 = arith.constant dense<0.000000e+00> : vector<8x128xf32>
    %106 = tpu.matmul %86, %8, %cst_27 {dimension_numbers = #tpu.dot_dimension_numbers<[1], [0], [0], [1], [0, 0, 1, 1], [], []>} : vector<8x32xf32>, vector<32x128xf32>, vector<8x128xf32> -> vector<8x128xf32>
    %107 = arith.addf %105, %106 : vector<8x128xf32>
    %108 = vector.broadcast %9 : vector<1x128xf32> to vector<8x128xf32>
    %109 = arith.addf %107, %108 : vector<8x128xf32>
    %110 = arith.negf %109 : vector<8x128xf32>
    %111 = math.exp %110 : vector<8x128xf32>
    %cst_28 = arith.constant 1.000000e+00 : f32
    %112 = vector.broadcast %cst_28 : f32 to vector<8x128xf32>
    %113 = arith.addf %112, %111 : vector<8x128xf32>
    %114 = arith.divf %112, %113 : vector<8x128xf32>
    %115 = math.tanh %109 : vector<8x128xf32>
    %116 = vector.extract_strided_slice %114 {offsets = [0, 0], sizes = [8, 32], strides = [1, 1]} : vector<8x128xf32> to vector<8x32xf32>
    %117 = vector.extract_strided_slice %114 {offsets = [0, 32], sizes = [8, 32], strides = [1, 1]} : vector<8x128xf32> to vector<8x32xf32>
    %118 = vector.extract_strided_slice %115 {offsets = [0, 64], sizes = [8, 32], strides = [1, 1]} : vector<8x128xf32> to vector<8x32xf32>
    %119 = vector.extract_strided_slice %114 {offsets = [0, 96], sizes = [8, 32], strides = [1, 1]} : vector<8x128xf32> to vector<8x32xf32>
    %120 = arith.mulf %117, %84 : vector<8x32xf32>
    %121 = arith.mulf %116, %118 : vector<8x32xf32>
    %122 = arith.addf %120, %121 : vector<8x32xf32>
    %123 = math.tanh %122 : vector<8x32xf32>
    %124 = arith.mulf %119, %123 : vector<8x32xf32>
    %125 = vector.extract_strided_slice %5 {offsets = [24, 0], sizes = [8, 128], strides = [1, 1]} : vector<64x128xf32> to vector<8x128xf32>
    %cst_29 = arith.constant dense<0.000000e+00> : vector<8x128xf32>
    %126 = tpu.matmul %104, %6, %cst_29 {dimension_numbers = #tpu.dot_dimension_numbers<[1], [0], [0], [1], [0, 0, 1, 1], [], []>} : vector<8x32xf32>, vector<32x128xf32>, vector<8x128xf32> -> vector<8x128xf32>
    %127 = arith.addf %125, %126 : vector<8x128xf32>
    %128 = arith.negf %127 : vector<8x128xf32>
    %129 = math.exp %128 : vector<8x128xf32>
    %cst_30 = arith.constant 1.000000e+00 : f32
    %130 = vector.broadcast %cst_30 : f32 to vector<8x128xf32>
    %131 = arith.addf %130, %129 : vector<8x128xf32>
    %132 = arith.divf %130, %131 : vector<8x128xf32>
    %133 = math.tanh %127 : vector<8x128xf32>
    %134 = vector.extract_strided_slice %132 {offsets = [0, 0], sizes = [8, 32], strides = [1, 1]} : vector<8x128xf32> to vector<8x32xf32>
    %135 = vector.extract_strided_slice %132 {offsets = [0, 32], sizes = [8, 32], strides = [1, 1]} : vector<8x128xf32> to vector<8x32xf32>
    %136 = vector.extract_strided_slice %133 {offsets = [0, 64], sizes = [8, 32], strides = [1, 1]} : vector<8x128xf32> to vector<8x32xf32>
    %137 = vector.extract_strided_slice %132 {offsets = [0, 96], sizes = [8, 32], strides = [1, 1]} : vector<8x128xf32> to vector<8x32xf32>
    %138 = arith.mulf %135, %102 : vector<8x32xf32>
    %139 = arith.mulf %134, %136 : vector<8x32xf32>
    %140 = arith.addf %138, %139 : vector<8x32xf32>
    %141 = math.tanh %140 : vector<8x32xf32>
    %142 = arith.mulf %137, %141 : vector<8x32xf32>
    %cst_31 = arith.constant dense<0.000000e+00> : vector<8x128xf32>
    %143 = tpu.matmul %142, %7, %cst_31 {dimension_numbers = #tpu.dot_dimension_numbers<[1], [0], [0], [1], [0, 0, 1, 1], [], []>} : vector<8x32xf32>, vector<32x128xf32>, vector<8x128xf32> -> vector<8x128xf32>
    %cst_32 = arith.constant dense<0.000000e+00> : vector<8x128xf32>
    %144 = tpu.matmul %124, %8, %cst_32 {dimension_numbers = #tpu.dot_dimension_numbers<[1], [0], [0], [1], [0, 0, 1, 1], [], []>} : vector<8x32xf32>, vector<32x128xf32>, vector<8x128xf32> -> vector<8x128xf32>
    %145 = arith.addf %143, %144 : vector<8x128xf32>
    %146 = vector.broadcast %9 : vector<1x128xf32> to vector<8x128xf32>
    %147 = arith.addf %145, %146 : vector<8x128xf32>
    %148 = arith.negf %147 : vector<8x128xf32>
    %149 = math.exp %148 : vector<8x128xf32>
    %cst_33 = arith.constant 1.000000e+00 : f32
    %150 = vector.broadcast %cst_33 : f32 to vector<8x128xf32>
    %151 = arith.addf %150, %149 : vector<8x128xf32>
    %152 = arith.divf %150, %151 : vector<8x128xf32>
    %153 = math.tanh %147 : vector<8x128xf32>
    %154 = vector.extract_strided_slice %152 {offsets = [0, 0], sizes = [8, 32], strides = [1, 1]} : vector<8x128xf32> to vector<8x32xf32>
    %155 = vector.extract_strided_slice %152 {offsets = [0, 32], sizes = [8, 32], strides = [1, 1]} : vector<8x128xf32> to vector<8x32xf32>
    %156 = vector.extract_strided_slice %153 {offsets = [0, 64], sizes = [8, 32], strides = [1, 1]} : vector<8x128xf32> to vector<8x32xf32>
    %157 = vector.extract_strided_slice %152 {offsets = [0, 96], sizes = [8, 32], strides = [1, 1]} : vector<8x128xf32> to vector<8x32xf32>
    %158 = arith.mulf %155, %122 : vector<8x32xf32>
    %159 = arith.mulf %154, %156 : vector<8x32xf32>
    %160 = arith.addf %158, %159 : vector<8x32xf32>
    %161 = math.tanh %160 : vector<8x32xf32>
    %162 = arith.mulf %157, %161 : vector<8x32xf32>
    %163 = vector.extract_strided_slice %5 {offsets = [32, 0], sizes = [8, 128], strides = [1, 1]} : vector<64x128xf32> to vector<8x128xf32>
    %cst_34 = arith.constant dense<0.000000e+00> : vector<8x128xf32>
    %164 = tpu.matmul %142, %6, %cst_34 {dimension_numbers = #tpu.dot_dimension_numbers<[1], [0], [0], [1], [0, 0, 1, 1], [], []>} : vector<8x32xf32>, vector<32x128xf32>, vector<8x128xf32> -> vector<8x128xf32>
    %165 = arith.addf %163, %164 : vector<8x128xf32>
    %166 = arith.negf %165 : vector<8x128xf32>
    %167 = math.exp %166 : vector<8x128xf32>
    %cst_35 = arith.constant 1.000000e+00 : f32
    %168 = vector.broadcast %cst_35 : f32 to vector<8x128xf32>
    %169 = arith.addf %168, %167 : vector<8x128xf32>
    %170 = arith.divf %168, %169 : vector<8x128xf32>
    %171 = math.tanh %165 : vector<8x128xf32>
    %172 = vector.extract_strided_slice %170 {offsets = [0, 0], sizes = [8, 32], strides = [1, 1]} : vector<8x128xf32> to vector<8x32xf32>
    %173 = vector.extract_strided_slice %170 {offsets = [0, 32], sizes = [8, 32], strides = [1, 1]} : vector<8x128xf32> to vector<8x32xf32>
    %174 = vector.extract_strided_slice %171 {offsets = [0, 64], sizes = [8, 32], strides = [1, 1]} : vector<8x128xf32> to vector<8x32xf32>
    %175 = vector.extract_strided_slice %170 {offsets = [0, 96], sizes = [8, 32], strides = [1, 1]} : vector<8x128xf32> to vector<8x32xf32>
    %176 = arith.mulf %173, %140 : vector<8x32xf32>
    %177 = arith.mulf %172, %174 : vector<8x32xf32>
    %178 = arith.addf %176, %177 : vector<8x32xf32>
    %179 = math.tanh %178 : vector<8x32xf32>
    %180 = arith.mulf %175, %179 : vector<8x32xf32>
    %cst_36 = arith.constant dense<0.000000e+00> : vector<8x128xf32>
    %181 = tpu.matmul %180, %7, %cst_36 {dimension_numbers = #tpu.dot_dimension_numbers<[1], [0], [0], [1], [0, 0, 1, 1], [], []>} : vector<8x32xf32>, vector<32x128xf32>, vector<8x128xf32> -> vector<8x128xf32>
    %cst_37 = arith.constant dense<0.000000e+00> : vector<8x128xf32>
    %182 = tpu.matmul %162, %8, %cst_37 {dimension_numbers = #tpu.dot_dimension_numbers<[1], [0], [0], [1], [0, 0, 1, 1], [], []>} : vector<8x32xf32>, vector<32x128xf32>, vector<8x128xf32> -> vector<8x128xf32>
    %183 = arith.addf %181, %182 : vector<8x128xf32>
    %184 = vector.broadcast %9 : vector<1x128xf32> to vector<8x128xf32>
    %185 = arith.addf %183, %184 : vector<8x128xf32>
    %186 = arith.negf %185 : vector<8x128xf32>
    %187 = math.exp %186 : vector<8x128xf32>
    %cst_38 = arith.constant 1.000000e+00 : f32
    %188 = vector.broadcast %cst_38 : f32 to vector<8x128xf32>
    %189 = arith.addf %188, %187 : vector<8x128xf32>
    %190 = arith.divf %188, %189 : vector<8x128xf32>
    %191 = math.tanh %185 : vector<8x128xf32>
    %192 = vector.extract_strided_slice %190 {offsets = [0, 0], sizes = [8, 32], strides = [1, 1]} : vector<8x128xf32> to vector<8x32xf32>
    %193 = vector.extract_strided_slice %190 {offsets = [0, 32], sizes = [8, 32], strides = [1, 1]} : vector<8x128xf32> to vector<8x32xf32>
    %194 = vector.extract_strided_slice %191 {offsets = [0, 64], sizes = [8, 32], strides = [1, 1]} : vector<8x128xf32> to vector<8x32xf32>
    %195 = vector.extract_strided_slice %190 {offsets = [0, 96], sizes = [8, 32], strides = [1, 1]} : vector<8x128xf32> to vector<8x32xf32>
    %196 = arith.mulf %193, %160 : vector<8x32xf32>
    %197 = arith.mulf %192, %194 : vector<8x32xf32>
    %198 = arith.addf %196, %197 : vector<8x32xf32>
    %199 = math.tanh %198 : vector<8x32xf32>
    %200 = arith.mulf %195, %199 : vector<8x32xf32>
    %201 = vector.extract_strided_slice %5 {offsets = [40, 0], sizes = [8, 128], strides = [1, 1]} : vector<64x128xf32> to vector<8x128xf32>
    %cst_39 = arith.constant dense<0.000000e+00> : vector<8x128xf32>
    %202 = tpu.matmul %180, %6, %cst_39 {dimension_numbers = #tpu.dot_dimension_numbers<[1], [0], [0], [1], [0, 0, 1, 1], [], []>} : vector<8x32xf32>, vector<32x128xf32>, vector<8x128xf32> -> vector<8x128xf32>
    %203 = arith.addf %201, %202 : vector<8x128xf32>
    %204 = arith.negf %203 : vector<8x128xf32>
    %205 = math.exp %204 : vector<8x128xf32>
    %cst_40 = arith.constant 1.000000e+00 : f32
    %206 = vector.broadcast %cst_40 : f32 to vector<8x128xf32>
    %207 = arith.addf %206, %205 : vector<8x128xf32>
    %208 = arith.divf %206, %207 : vector<8x128xf32>
    %209 = math.tanh %203 : vector<8x128xf32>
    %210 = vector.extract_strided_slice %208 {offsets = [0, 0], sizes = [8, 32], strides = [1, 1]} : vector<8x128xf32> to vector<8x32xf32>
    %211 = vector.extract_strided_slice %208 {offsets = [0, 32], sizes = [8, 32], strides = [1, 1]} : vector<8x128xf32> to vector<8x32xf32>
    %212 = vector.extract_strided_slice %209 {offsets = [0, 64], sizes = [8, 32], strides = [1, 1]} : vector<8x128xf32> to vector<8x32xf32>
    %213 = vector.extract_strided_slice %208 {offsets = [0, 96], sizes = [8, 32], strides = [1, 1]} : vector<8x128xf32> to vector<8x32xf32>
    %214 = arith.mulf %211, %178 : vector<8x32xf32>
    %215 = arith.mulf %210, %212 : vector<8x32xf32>
    %216 = arith.addf %214, %215 : vector<8x32xf32>
    %217 = math.tanh %216 : vector<8x32xf32>
    %218 = arith.mulf %213, %217 : vector<8x32xf32>
    %cst_41 = arith.constant dense<0.000000e+00> : vector<8x128xf32>
    %219 = tpu.matmul %218, %7, %cst_41 {dimension_numbers = #tpu.dot_dimension_numbers<[1], [0], [0], [1], [0, 0, 1, 1], [], []>} : vector<8x32xf32>, vector<32x128xf32>, vector<8x128xf32> -> vector<8x128xf32>
    %cst_42 = arith.constant dense<0.000000e+00> : vector<8x128xf32>
    %220 = tpu.matmul %200, %8, %cst_42 {dimension_numbers = #tpu.dot_dimension_numbers<[1], [0], [0], [1], [0, 0, 1, 1], [], []>} : vector<8x32xf32>, vector<32x128xf32>, vector<8x128xf32> -> vector<8x128xf32>
    %221 = arith.addf %219, %220 : vector<8x128xf32>
    %222 = vector.broadcast %9 : vector<1x128xf32> to vector<8x128xf32>
    %223 = arith.addf %221, %222 : vector<8x128xf32>
    %224 = arith.negf %223 : vector<8x128xf32>
    %225 = math.exp %224 : vector<8x128xf32>
    %cst_43 = arith.constant 1.000000e+00 : f32
    %226 = vector.broadcast %cst_43 : f32 to vector<8x128xf32>
    %227 = arith.addf %226, %225 : vector<8x128xf32>
    %228 = arith.divf %226, %227 : vector<8x128xf32>
    %229 = math.tanh %223 : vector<8x128xf32>
    %230 = vector.extract_strided_slice %228 {offsets = [0, 0], sizes = [8, 32], strides = [1, 1]} : vector<8x128xf32> to vector<8x32xf32>
    %231 = vector.extract_strided_slice %228 {offsets = [0, 32], sizes = [8, 32], strides = [1, 1]} : vector<8x128xf32> to vector<8x32xf32>
    %232 = vector.extract_strided_slice %229 {offsets = [0, 64], sizes = [8, 32], strides = [1, 1]} : vector<8x128xf32> to vector<8x32xf32>
    %233 = vector.extract_strided_slice %228 {offsets = [0, 96], sizes = [8, 32], strides = [1, 1]} : vector<8x128xf32> to vector<8x32xf32>
    %234 = arith.mulf %231, %198 : vector<8x32xf32>
    %235 = arith.mulf %230, %232 : vector<8x32xf32>
    %236 = arith.addf %234, %235 : vector<8x32xf32>
    %237 = math.tanh %236 : vector<8x32xf32>
    %238 = arith.mulf %233, %237 : vector<8x32xf32>
    %239 = vector.extract_strided_slice %5 {offsets = [48, 0], sizes = [8, 128], strides = [1, 1]} : vector<64x128xf32> to vector<8x128xf32>
    %cst_44 = arith.constant dense<0.000000e+00> : vector<8x128xf32>
    %240 = tpu.matmul %218, %6, %cst_44 {dimension_numbers = #tpu.dot_dimension_numbers<[1], [0], [0], [1], [0, 0, 1, 1], [], []>} : vector<8x32xf32>, vector<32x128xf32>, vector<8x128xf32> -> vector<8x128xf32>
    %241 = arith.addf %239, %240 : vector<8x128xf32>
    %242 = arith.negf %241 : vector<8x128xf32>
    %243 = math.exp %242 : vector<8x128xf32>
    %cst_45 = arith.constant 1.000000e+00 : f32
    %244 = vector.broadcast %cst_45 : f32 to vector<8x128xf32>
    %245 = arith.addf %244, %243 : vector<8x128xf32>
    %246 = arith.divf %244, %245 : vector<8x128xf32>
    %247 = math.tanh %241 : vector<8x128xf32>
    %248 = vector.extract_strided_slice %246 {offsets = [0, 0], sizes = [8, 32], strides = [1, 1]} : vector<8x128xf32> to vector<8x32xf32>
    %249 = vector.extract_strided_slice %246 {offsets = [0, 32], sizes = [8, 32], strides = [1, 1]} : vector<8x128xf32> to vector<8x32xf32>
    %250 = vector.extract_strided_slice %247 {offsets = [0, 64], sizes = [8, 32], strides = [1, 1]} : vector<8x128xf32> to vector<8x32xf32>
    %251 = vector.extract_strided_slice %246 {offsets = [0, 96], sizes = [8, 32], strides = [1, 1]} : vector<8x128xf32> to vector<8x32xf32>
    %252 = arith.mulf %249, %216 : vector<8x32xf32>
    %253 = arith.mulf %248, %250 : vector<8x32xf32>
    %254 = arith.addf %252, %253 : vector<8x32xf32>
    %255 = math.tanh %254 : vector<8x32xf32>
    %256 = arith.mulf %251, %255 : vector<8x32xf32>
    %cst_46 = arith.constant dense<0.000000e+00> : vector<8x128xf32>
    %257 = tpu.matmul %256, %7, %cst_46 {dimension_numbers = #tpu.dot_dimension_numbers<[1], [0], [0], [1], [0, 0, 1, 1], [], []>} : vector<8x32xf32>, vector<32x128xf32>, vector<8x128xf32> -> vector<8x128xf32>
    %cst_47 = arith.constant dense<0.000000e+00> : vector<8x128xf32>
    %258 = tpu.matmul %238, %8, %cst_47 {dimension_numbers = #tpu.dot_dimension_numbers<[1], [0], [0], [1], [0, 0, 1, 1], [], []>} : vector<8x32xf32>, vector<32x128xf32>, vector<8x128xf32> -> vector<8x128xf32>
    %259 = arith.addf %257, %258 : vector<8x128xf32>
    %260 = vector.broadcast %9 : vector<1x128xf32> to vector<8x128xf32>
    %261 = arith.addf %259, %260 : vector<8x128xf32>
    %262 = arith.negf %261 : vector<8x128xf32>
    %263 = math.exp %262 : vector<8x128xf32>
    %cst_48 = arith.constant 1.000000e+00 : f32
    %264 = vector.broadcast %cst_48 : f32 to vector<8x128xf32>
    %265 = arith.addf %264, %263 : vector<8x128xf32>
    %266 = arith.divf %264, %265 : vector<8x128xf32>
    %267 = math.tanh %261 : vector<8x128xf32>
    %268 = vector.extract_strided_slice %266 {offsets = [0, 0], sizes = [8, 32], strides = [1, 1]} : vector<8x128xf32> to vector<8x32xf32>
    %269 = vector.extract_strided_slice %266 {offsets = [0, 32], sizes = [8, 32], strides = [1, 1]} : vector<8x128xf32> to vector<8x32xf32>
    %270 = vector.extract_strided_slice %267 {offsets = [0, 64], sizes = [8, 32], strides = [1, 1]} : vector<8x128xf32> to vector<8x32xf32>
    %271 = vector.extract_strided_slice %266 {offsets = [0, 96], sizes = [8, 32], strides = [1, 1]} : vector<8x128xf32> to vector<8x32xf32>
    %272 = arith.mulf %269, %236 : vector<8x32xf32>
    %273 = arith.mulf %268, %270 : vector<8x32xf32>
    %274 = arith.addf %272, %273 : vector<8x32xf32>
    %275 = math.tanh %274 : vector<8x32xf32>
    %276 = arith.mulf %271, %275 : vector<8x32xf32>
    %277 = vector.extract_strided_slice %5 {offsets = [56, 0], sizes = [8, 128], strides = [1, 1]} : vector<64x128xf32> to vector<8x128xf32>
    %cst_49 = arith.constant dense<0.000000e+00> : vector<8x128xf32>
    %278 = tpu.matmul %256, %6, %cst_49 {dimension_numbers = #tpu.dot_dimension_numbers<[1], [0], [0], [1], [0, 0, 1, 1], [], []>} : vector<8x32xf32>, vector<32x128xf32>, vector<8x128xf32> -> vector<8x128xf32>
    %279 = arith.addf %277, %278 : vector<8x128xf32>
    %280 = arith.negf %279 : vector<8x128xf32>
    %281 = math.exp %280 : vector<8x128xf32>
    %cst_50 = arith.constant 1.000000e+00 : f32
    %282 = vector.broadcast %cst_50 : f32 to vector<8x128xf32>
    %283 = arith.addf %282, %281 : vector<8x128xf32>
    %284 = arith.divf %282, %283 : vector<8x128xf32>
    %285 = math.tanh %279 : vector<8x128xf32>
    %286 = vector.extract_strided_slice %284 {offsets = [0, 0], sizes = [8, 32], strides = [1, 1]} : vector<8x128xf32> to vector<8x32xf32>
    %287 = vector.extract_strided_slice %284 {offsets = [0, 32], sizes = [8, 32], strides = [1, 1]} : vector<8x128xf32> to vector<8x32xf32>
    %288 = vector.extract_strided_slice %285 {offsets = [0, 64], sizes = [8, 32], strides = [1, 1]} : vector<8x128xf32> to vector<8x32xf32>
    %289 = vector.extract_strided_slice %284 {offsets = [0, 96], sizes = [8, 32], strides = [1, 1]} : vector<8x128xf32> to vector<8x32xf32>
    %290 = arith.mulf %287, %254 : vector<8x32xf32>
    %291 = arith.mulf %286, %288 : vector<8x32xf32>
    %292 = arith.addf %290, %291 : vector<8x32xf32>
    %293 = math.tanh %292 : vector<8x32xf32>
    %294 = arith.mulf %289, %293 : vector<8x32xf32>
    %cst_51 = arith.constant dense<0.000000e+00> : vector<8x128xf32>
    %295 = tpu.matmul %294, %7, %cst_51 {dimension_numbers = #tpu.dot_dimension_numbers<[1], [0], [0], [1], [0, 0, 1, 1], [], []>} : vector<8x32xf32>, vector<32x128xf32>, vector<8x128xf32> -> vector<8x128xf32>
    %cst_52 = arith.constant dense<0.000000e+00> : vector<8x128xf32>
    %296 = tpu.matmul %276, %8, %cst_52 {dimension_numbers = #tpu.dot_dimension_numbers<[1], [0], [0], [1], [0, 0, 1, 1], [], []>} : vector<8x32xf32>, vector<32x128xf32>, vector<8x128xf32> -> vector<8x128xf32>
    %297 = arith.addf %295, %296 : vector<8x128xf32>
    %298 = vector.broadcast %9 : vector<1x128xf32> to vector<8x128xf32>
    %299 = arith.addf %297, %298 : vector<8x128xf32>
    %300 = arith.negf %299 : vector<8x128xf32>
    %301 = math.exp %300 : vector<8x128xf32>
    %cst_53 = arith.constant 1.000000e+00 : f32
    %302 = vector.broadcast %cst_53 : f32 to vector<8x128xf32>
    %303 = arith.addf %302, %301 : vector<8x128xf32>
    %304 = arith.divf %302, %303 : vector<8x128xf32>
    %305 = math.tanh %299 : vector<8x128xf32>
    %306 = vector.extract_strided_slice %304 {offsets = [0, 0], sizes = [8, 32], strides = [1, 1]} : vector<8x128xf32> to vector<8x32xf32>
    %307 = vector.extract_strided_slice %304 {offsets = [0, 32], sizes = [8, 32], strides = [1, 1]} : vector<8x128xf32> to vector<8x32xf32>
    %308 = vector.extract_strided_slice %305 {offsets = [0, 64], sizes = [8, 32], strides = [1, 1]} : vector<8x128xf32> to vector<8x32xf32>
    %309 = vector.extract_strided_slice %304 {offsets = [0, 96], sizes = [8, 32], strides = [1, 1]} : vector<8x128xf32> to vector<8x32xf32>
    %310 = arith.mulf %307, %274 : vector<8x32xf32>
    %311 = arith.mulf %306, %308 : vector<8x32xf32>
    %312 = arith.addf %310, %311 : vector<8x32xf32>
    %313 = math.tanh %312 : vector<8x32xf32>
    %314 = arith.mulf %309, %313 : vector<8x32xf32>
    %c0_54 = arith.constant 0 : index
    %c0_55 = arith.constant 0 : index
    %315 = vector.load %arg7[%c0_54, %c0_55] : memref<32x128xf32, #tpu.memory_space<vmem>>, vector<32x128xf32>
    %cst_56 = arith.constant dense<0.000000e+00> : vector<8x128xf32>
    %316 = tpu.matmul %314, %315, %cst_56 {dimension_numbers = #tpu.dot_dimension_numbers<[1], [0], [0], [1], [0, 0, 1, 1], [], []>} : vector<8x32xf32>, vector<32x128xf32>, vector<8x128xf32> -> vector<8x128xf32>
    %c0_57 = arith.constant 0 : index
    %c0_58 = arith.constant 0 : index
    %317 = vector.load %arg8[%c0_57, %c0_58] : memref<1x128xf32, #tpu.memory_space<vmem>>, vector<1x128xf32>
    %318 = vector.broadcast %317 : vector<1x128xf32> to vector<8x128xf32>
    %319 = arith.addf %316, %318 : vector<8x128xf32>
    %c0_59 = arith.constant 0 : index
    %c0_60 = arith.constant 0 : index
    %320 = vector.load %arg9[%c0_59, %c0_60] : memref<8x128xf32, #tpu.memory_space<vmem>>, vector<8x128xf32>
    tpu.vector_store %arg9[%c0_59, %c0_60], %319 {strides = array<i32>} : memref<8x128xf32, #tpu.memory_space<vmem>>, vector<8x128xf32>,
    return
  }
}

</mosaic_0001>

<bundles_post_ra>
// kernel: lstm_model_forward.1
= control target key start
LH: loop header
LB: loop body
LE: loop exit
PB: predicated region body
PF: predicated region fallthrough
CT: control target
= control target key end

     0   :  { %v3223_v2 = vmov 0.0|0.0   ;;  %vm51_vm0 = vcmask 261120   ;;  %vm3224_vm1 = vmmov 0   ;;  %v3225_v4 = vmov 0.0   ;;  %s3226_s29 = smov 64   ;;  %s3227_s30 = smov 32   ;;  %s3726_s1 = inlined_call_operand.vmem [shape: f32[32,128], index: 1, kind: input, shape index: {}]   ;;  %s3727_s2 = inlined_call_operand.vmem [shape: f32[32,128], index: 2, kind: input, shape index: {}]   ;;  %s3728_s0 = inlined_call_operand.vmem [shape: f32[64,32], index: 0, kind: input, shape index: {}]   ;;  %s3729_s3 = inlined_call_operand.vmem [shape: f32[1,128], index: 3, kind: input, shape index: {}]   ;;  %s3730_s4 = inlined_call_operand.vmem [shape: f32[32,128], index: 4, kind: input, shape index: {}]   ;;  %s3731_s5 = inlined_call_operand.vmem [shape: f32[32,128], index: 5, kind: input, shape index: {}]   ;;  %s3732_s6 = inlined_call_operand.vmem [shape: f32[1,128], index: 6, kind: input, shape index: {}]   ;;  %s3733_s7 = inlined_call_operand.vmem [shape: f32[32,128], index: 7, kind: input, shape index: {}]   ;;  %s3734_s8 = inlined_call_operand.vmem [shape: f32[1,128], index: 8, kind: input, shape index: {}]   ;;  %s3735_s9 = inlined_call_operand.vmem [shape: f32[8,128], index: 9, kind: output, shape index: {}]  }
   0x1   :  { %v40_v0 = vld [vmem:[%s3726_s1] sm:$0xff]  ;;  %v41_v1 = vld [vmem:[%s3726_s1 + $0x8] sm:$0xff]  ;;  %2939 = vmatprep.subr.bf16.mxu1 %v3223_v2  ;;  %2664 = vmatprep.mubr.msk.f32.mxu1 %vm3224_vm1, %v3225_v4  ;;  %v42_v7 = vld [vmem:[%s3726_s1 + $0x10] sm:$0xff] }
   0x2   :  { %v181_v3 = vld [vmem:[%s3727_s2] sm:$0xff]  ;;  %v2931_v5 = vpack.c.bf16 %v41_v1, %v40_v0  ;;  %v182_v6 = vld [vmem:[%s3727_s2 + $0x8] sm:$0xff]  ;;  %v43_v8 = vld [vmem:[%s3726_s1 + $0x18] sm:$0xff] }
   0x3   :  { %v3299_v9 = vpack.c.bf16 %v182_v6, %v181_v3  ;;  %v2935_v10 = vpack.c.bf16 %v43_v8, %v42_v7  ;;  %v32_v11 = vld [vmem:[%s3728_s0] sm:$0xff]  ;;  %v183_v12 = vld [vmem:[%s3727_s2 + $0x10] sm:$0xff]  ;;  %v184_v13 = vld [vmem:[%s3727_s2 + $0x18] sm:$0xff] }
   0x4   :  { %2932 = vmatprep.subr.bf16.mxu0 %v2931_v5  ;;  %2644 = vmatprep.mubr.msk.f32.mxu0 %vm51_vm0, %v32_v11  ;;  %v3312_v14 = vpack.c.bf16 %v184_v13, %v183_v12  ;;  %v33_v15 = vld [vmem:[%s3728_s0 + $0x8] sm:$0xff]  ;;  %v3328_v16 = vld [vmem:[%s3729_s3] ss:$0 sm:$0xff]  ;;  %v34_v33 = vld [vmem:[%s3728_s0 + $0x10] sm:$0xff] }
   0x5   :  { %2934 = vmatpush3.bf16.msra.mxu0 %v2931_v5  ;;  %2941 = vmatpush3.bf16.msra.mxu1 %v3299_v9  ;;  %v35_v34 = vld [vmem:[%s3728_s0 + $0x18] sm:$0xff]  ;;  %v36_v35 = vld [vmem:[%s3728_s0 + $0x20] sm:$0xff]  ;;  %v186_v37 = vld [vmem:[%s3730_s4 + $0x8] sm:$0xff] }
   0x6   :  { %2936 = vmatprep.subr.bf16.mxu0 %v2935_v10  ;;  %2942 = vmatprep.subr.bf16.mxu1 %v3223_v2  ;;  %v185_v36 = vld [vmem:[%s3730_s4] sm:$0xff]  ;;  %v190_v40 = vld [vmem:[%s3731_s5 + $0x8] sm:$0xff]  ;;  %v191_v41 = vld [vmem:[%s3731_s5 + $0x10] sm:$0xff] }
   0x7   :  { %v189_v38 = vld [vmem:[%s3731_s5] sm:$0xff]  ;;  %v3357_v39 = vpack.c.bf16 %v186_v37, %v185_v36  ;;  %v192_v42 = vld [vmem:[%s3731_s5 + $0x18] sm:$0xff]  ;;  %v37_v44 = vld [vmem:[%s3728_s0 + $0x28] sm:$0xff] }
   0x8   :  { %v3369_v43 = vpack.c.bf16 %v190_v40, %v189_v38  ;;  %v187_v45 = vld [vmem:[%s3730_s4 + $0x10] sm:$0xff]  ;;  %v188_v46 = vld [vmem:[%s3730_s4 + $0x18] sm:$0xff]  ;;  %v3388_v49 = vpack.c.bf16 %v192_v42, %v191_v41  ;;  %v3444_v0 = vld [vmem:[%s3732_s6] ss:$0 sm:$0xff] }
   0x9   :  { %2938 = vmatpush3.bf16.msra.mxu0 %v2935_v10  ;;  %2944 = vmatpush3.bf16.msra.mxu1 %v3312_v14  ;;  %v3382_v47 = vpack.c.bf16 %v188_v46, %v187_v45  ;;  %v38_v48 = vld [vmem:[%s3728_s0 + $0x30] sm:$0xff]  ;;  %v39_v50 = vld [vmem:[%s3728_s0 + $0x38] sm:$0xff] }
   0xa   :  { %2951 = vmatprep.subr.bf16.mxu0 %v3223_v2  ;;  %2945 = vmatprep.subr.bf16.mxu1 %v3223_v2 }
   0xc   :  { %2645 = vmatmul.mubr.msk.f32.vlgmr.msra.gmra.mrb[0].mxu0 %vm51_vm0, %v33_v15  ;;  %2665 = vmatmul.mubr.f32.vlgmr.msra.gmra.mrb[0].mxu1 %v3225_v4 }
   0xd   :  { %2675 = vmatprep.mubr.msk.f32.mxu1 %vm3224_vm1, %v3225_v4  ;;  %2647 = vmatprep.mubr.msk.f32.mxu0 %vm51_vm0, %v34_v33 }
   0xe   :  { %2953 = vmatpush3.bf16.msra.mxu0 %v3357_v39  ;;  %2947 = vmatpush3.bf16.msra.mxu1 %v3369_v43 }
   0xf   :  { %2954 = vmatprep.subr.bf16.mxu0 %v3223_v2  ;;  %2948 = vmatprep.subr.bf16.mxu1 %v3223_v2 }
  0x10   :  { %2648 = vmatmul.mubr.msk.f32.gmra.mrb[2].mxu0 %vm51_vm0, %v35_v34 }
  0x11   :  { %2650 = vmatprep.mubr.msk.f32.mxu0 %vm51_vm0, %v36_v35 }
  0x12   :  { %2956 = vmatpush3.bf16.msra.mxu0 %v3382_v47  ;;  %2950 = vmatpush3.bf16.msra.mxu1 %v3388_v49 }
  0x13   :  { %2963 = vmatprep.subr.bf16.mxu0 %v3223_v2  ;;  %2957 = vmatprep.subr.bf16.mxu1 %v3223_v2 }
  0x14   :  { %2651 = vmatmul.mubr.msk.f32.gmra.mrb[4].mxu0 %vm51_vm0, %v37_v44 }
  0x15   :  { %2653 = vmatprep.mubr.msk.f32.mxu0 %vm51_vm0, %v38_v48  ;;  %2676 = vmatmul.mubr.f32.vlgmr.msra.gmra.mrb[2].mxu1 %v3225_v4 }
  0x16   :  { %2959 = vmatpush3.bf16.msra.mxu1 %v3299_v9  ;;  %2697 = vmatprep.mubr.msk.f32.mxu1 %vm3224_vm1, %v3225_v4 }
  0x17   :  { %2960 = vmatprep.subr.bf16.mxu1 %v3223_v2 }
  0x18   :  { %2654 = vmatmul.mubr.msk.f32.gmra.mrb[6].mxu0 %vm51_vm0, %v39_v50 }
  0x19   :  { %2686 = vmatprep.mubr.msk.f32.mxu0 %vm3224_vm1, %v3225_v4 }
  0x1a   :  { %2962 = vmatpush3.bf16.msra.mxu1 %v3312_v14 }
  0x1b   :  { %2969 = vmatprep.subr.bf16.mxu1 %v3223_v2 }
  0xdf   :  { %v3330_v17 = vpop.f32.mrb[0].mxu0  ;;  %v263_v18 = vpop.f32.mrb[0].mxu1 }
  0xe0   :  { %v142_v19 = vpop.f32.mrb[1].mxu0  ;;  %v2666_v20 = vpop.f32.mrb[1].mxu1  ;;  %v148_v63 = vadd.f32 %v3330_v17, %v3328_v16 }
  0xe1   :  { %v143_v21 = vadd.f32 %v3328_v16, %v142_v19 }
  0xe3   :  { %v267_v22 = vadd.f32 %v263_v18, %v143_v21  ;;  %v3413_v54 = vpop.f32.mrb[2].mxu0 }
  0xe4   :  { %v3415_v55 = vpop.f32.mrb[3].mxu0 }
  0xe5   :  { %3094 = vtanh.f32 %v267_v22  ;;  %v2458_v24 = vmul.f32 -1.442695, %v267_v22 }
  0xe7   :  { %3096 = vpow2.f32 %v2458_v24  ;;  %v3417_v56 = vpop.f32.mrb[4].mxu0 }
  0xe8   :  { %v3419_v57 = vpop.f32.mrb[5].mxu0  ;;  %v358_v60 = vpop.f32.mrb[2].mxu1 }
  0xe9   :  { %v2677_v61 = vpop.f32.mrb[3].mxu1 }
  0xeb   :  { %v3421_v58 = vpop.f32.mrb[6].mxu0 }
  0xec   :  { %v3423_v59 = vpop.f32.mrb[7].mxu0 }
  0xef   :  { %v3095_v23 = vpop.eup %3094 }
  0xf0   :  { %277 = vrot.lane.b32.xlu0 %v3095_v23, %s3226_s29 }
  0xf1   :  { %v3097_v25 = vpop.eup %3096 }
  0xf2   :  { %v271_v26 = vadd.f32 1.0, %v3097_v25 }
  0xf4   :  { %3098 = vrcp.f32 %v271_v26 }
  0xfe   :  { %v3099_v27 = vpop.eup %3098 }
  0xff   :  { %v275_v30 = vmul.f32 0.0, %v3099_v27 }
 0x162   :  { %v278_v28 = vpop.permute.xlu0 %277 }
 0x163   :  { %v280_v29 = vmul.f32 %v3099_v27, %v278_v28 }
 0x165   :  { %282 = vrot.lane.b32.xlu0 %v280_v29, %s3227_s30 }
 0x1d7   :  { %v283_v31 = vpop.permute.xlu0 %282 }
 0x1d8   :  { %v3335_v32 = vadd.f32 %v283_v31, %v275_v30 }
 0x1da   :  { %3100 = vtanh.f32 %v3335_v32 }
 0x1e4   :  { %v3101_v51 = vpop.eup %3100 }
 0x1e5   :  { %288 = vrot.lane.b32.xlu1 %v3101_v51, %s3226_s29  ;;  %v153_v51 = vadd.f32 %v3328_v16, %v3415_v55 }
 0x257   :  { %v289_v52 = vpop.permute.xlu1 %288 }
 0x258   :  { %v291_v53 = vmul.f32 %v3099_v27, %v289_v52 }
 0x25a   :  { %363 = vrot.lane.b32.xlu1 %v291_v53, %s3227_s30 }
 0x2cc   :  { %v364_v62 = vpop.permute.xlu1 %363 }
 0x2cd   :  { %2687 = vmatmul.mubr.msk.f32.vlgmr.msra.gmra.mrb[8].mxu0 %vm51_vm0, %v364_v62  ;;  %2698 = vmatmul.mubr.msk.f32.vlgmr.msra.gmra.mrb[4].mxu1 %vm51_vm0, %v364_v62 }
 0x2ce   :  { %2971 = vmatpush3.bf16.msra.mxu1 %v3357_v39  ;;  %2965 = vmatpush3.bf16.msra.mxu0 %v3369_v43 }
 0x2cf   :  { %2972 = vmatprep.subr.bf16.mxu1 %v3223_v2  ;;  %2966 = vmatprep.subr.bf16.mxu0 %v3223_v2 }
 0x2d0   :  { %2719 = vmatprep.mubr.msk.f32.mxu1 %vm3224_vm1, %v3225_v4  ;;  %2708 = vmatprep.mubr.msk.f32.mxu0 %vm3224_vm1, %v3225_v4 }
 0x2d2   :  { %2974 = vmatpush3.bf16.msra.mxu1 %v3382_v47  ;;  %2968 = vmatpush3.bf16.msra.mxu0 %v3388_v49 }
 0x2d3   :  { %2975 = vmatprep.subr.bf16.mxu0 %v3223_v2  ;;  %2981 = vmatprep.subr.bf16.mxu1 %v3223_v2 }
 0x3a0   :  { %v433_v1 = vpop.f32.mrb[8].mxu0  ;;  %v534_v3 = vpop.f32.mrb[4].mxu1 }
 0x3a1   :  { %v434_v5 = vadd.f32 %v433_v1, %v358_v60  ;;  %v538_v6 = vadd.f32 %v534_v3, %v148_v63  ;;  %v2688_v7 = vpop.f32.mrb[9].mxu0  ;;  %v2699_v8 = vpop.f32.mrb[5].mxu1 }
 0x3a3   :  { %v443_v10 = vadd.f32 %v3444_v0, %v434_v5  ;;  %3102 = vtanh.f32 %v538_v6  ;;  %v2463_v13 = vmul.f32 -1.442695, %v538_v6 }
 0x3a5   :  { %3104 = vtanh.f32 %v443_v10  ;;  %v2461_v15 = vmul.f32 -1.442695, %v443_v10 }
 0x3a6   :  { %3106 = vpow2.f32 %v2463_v13 }
 0x3a7   :  { %3108 = vpow2.f32 %v2461_v15 }
 0x3ad   :  { %v3103_v11 = vpop.eup %3102 }
 0x3ae   :  { %548 = vrot.lane.b32.xlu1 %v3103_v11, %s3226_s29 }
 0x3af   :  { %v3105_v12 = vpop.eup %3104 }
 0x3b0   :  { %453 = vrot.lane.b32.xlu0 %v3105_v12, %s3226_s29  ;;  %v3107_v17 = vpop.eup %3106 }
 0x3b1   :  { %v3109_v18 = vpop.eup %3108  ;;  %v542_v19 = vadd.f32 1.0, %v3107_v17 }
 0x3b2   :  { %v447_v20 = vadd.f32 1.0, %v3109_v18 }
 0x3b3   :  { %3110 = vrcp.f32 %v542_v19 }
 0x3b4   :  { %3112 = vrcp.f32 %v447_v20 }
 0x3bd   :  { %v3111_v21 = vpop.eup %3110 }
 0x3be   :  { %v3113_v24 = vpop.eup %3112  ;;  %v546_v27 = vmul.f32 %v3111_v21, %v3335_v32 }
 0x3bf   :  { %v451_v30 = vmul.f32 0.0, %v3113_v24 }
 0x420   :  { %v549_v22 = vpop.permute.xlu1 %548 }
 0x421   :  { %v551_v23 = vmul.f32 %v3111_v21, %v549_v22 }
 0x422   :  { %v454_v25 = vpop.permute.xlu0 %453 }
 0x423   :  { %v456_v26 = vmul.f32 %v3113_v24, %v454_v25  ;;  %553 = vrot.lane.b32.xlu1 %v551_v23, %s3227_s30 }
 0x425   :  { %458 = vrot.lane.b32.xlu0 %v456_v26, %s3227_s30 }
 0x495   :  { %v554_v28 = vpop.permute.xlu1 %553 }
 0x496   :  { %v3452_v29 = vadd.f32 %v554_v28, %v546_v27 }
 0x497   :  { %v459_v31 = vpop.permute.xlu0 %458 }
 0x498   :  { %3114 = vtanh.f32 %v3452_v29  ;;  %v3455_v33 = vadd.f32 %v459_v31, %v451_v30 }
 0x49a   :  { %3116 = vtanh.f32 %v3455_v33 }
 0x4a2   :  { %v3115_v34 = vpop.eup %3114 }
 0x4a3   :  { %559 = vrot.lane.b32.xlu1 %v3115_v34, %s3226_s29  ;;  %v158_v34 = vadd.f32 %v3413_v54, %v3328_v16 }
 0x4a4   :  { %v3117_v35 = vpop.eup %3116 }
 0x4a5   :  { %464 = vrot.lane.b32.xlu0 %v3117_v35, %s3226_s29 }
 0x515   :  { %v560_v36 = vpop.permute.xlu1 %559 }
 0x516   :  { %v562_v37 = vmul.f32 %v3111_v21, %v560_v36 }
 0x517   :  { %v465_v32 = vpop.permute.xlu0 %464 }
 0x518   :  { %v467_v38 = vmul.f32 %v3113_v24, %v465_v32  ;;  %639 = vrot.lane.b32.xlu1 %v562_v37, %s3227_s30 }
 0x51a   :  { %564 = vrot.lane.b32.xlu0 %v467_v38, %s3227_s30 }
 0x58a   :  { %v640_v40 = vpop.permute.xlu1 %639 }
 0x58b   :  { %2720 = vmatmul.mubr.msk.f32.vlgmr.msra.gmra.mrb[6].mxu1 %vm51_vm0, %v640_v40 }
 0x58c   :  { %v565_v41 = vpop.permute.xlu0 %564  ;;  %2983 = vmatpush3.bf16.msra.mxu1 %v3369_v43  ;;  %2741 = vmatprep.mubr.msk.f32.mxu1 %vm3224_vm1, %v3225_v4 }
 0x58d   :  { %2709 = vmatmul.mubr.msk.f32.vlgmr.msra.gmra.mrb[10].mxu0 %vm51_vm0, %v565_v41  ;;  %2984 = vmatprep.subr.bf16.mxu1 %v3223_v2 }
 0x58e   :  { %2977 = vmatpush3.bf16.msra.mxu0 %v3299_v9  ;;  %2730 = vmatprep.mubr.msk.f32.mxu0 %vm3224_vm1, %v3225_v4 }
 0x58f   :  { %2978 = vmatprep.subr.bf16.mxu0 %v3223_v2 }
 0x590   :  { %2986 = vmatpush3.bf16.msra.mxu1 %v3388_v49 }
 0x591   :  { %2993 = vmatprep.subr.bf16.mxu1 %v3223_v2 }
 0x592   :  { %2980 = vmatpush3.bf16.msra.mxu0 %v3312_v14 }
 0x593   :  { %2987 = vmatprep.subr.bf16.mxu0 %v3223_v2 }
 0x595   :  { %2731 = vmatmul.mubr.msk.f32.vlgmr.msra.gmra.mrb[12].mxu0 %vm51_vm0, %v640_v40 }
 0x596   :  { %2989 = vmatpush3.bf16.msra.mxu0 %v3357_v39  ;;  %2752 = vmatprep.mubr.msk.f32.mxu0 %vm3224_vm1, %v3225_v4 }
 0x597   :  { %2990 = vmatprep.subr.bf16.mxu0 %v3223_v2 }
 0x59a   :  { %2992 = vmatpush3.bf16.msra.mxu0 %v3382_v47 }
 0x59b   :  { %2999 = vmatprep.subr.bf16.mxu0 %v3223_v2 }
 0x65e   :  { %v709_v42 = vpop.f32.mrb[6].mxu1 }
 0x65f   :  { %v2721_v44 = vpop.f32.mrb[7].mxu1 }
 0x660   :  { %v634_v45 = vpop.f32.mrb[10].mxu0 }
 0x661   :  { %v710_v46 = vadd.f32 %v709_v42, %v634_v45  ;;  %v2710_v48 = vpop.f32.mrb[11].mxu0 }
 0x663   :  { %v713_v50 = vadd.f32 %v3444_v0, %v710_v46 }
 0x665   :  { %3118 = vtanh.f32 %v713_v50  ;;  %v2466_v63 = vmul.f32 -1.442695, %v713_v50 }
 0x668   :  { %v804_v52 = vpop.f32.mrb[12].mxu0 }
 0x669   :  { %v808_v53 = vadd.f32 %v804_v52, %v153_v51  ;;  %v2732_v60 = vpop.f32.mrb[13].mxu0 }
 0x66b   :  { %3120 = vtanh.f32 %v808_v53  ;;  %v2468_v1 = vmul.f32 -1.442695, %v808_v53 }
 0x66c   :  { %3122 = vpow2.f32 %v2466_v63 }
 0x66d   :  { %3124 = vpow2.f32 %v2468_v1 }
 0x66f   :  { %v3119_v61 = vpop.eup %3118 }
 0x670   :  { %723 = vrot.lane.b32.xlu0 %v3119_v61, %s3226_s29 }
 0x675   :  { %v3121_v62 = vpop.eup %3120 }
 0x676   :  { %818 = vrot.lane.b32.xlu1 %v3121_v62, %s3226_s29  ;;  %v3123_v3 = vpop.eup %3122 }
 0x677   :  { %v717_v5 = vadd.f32 1.0, %v3123_v3  ;;  %v3125_v6 = vpop.eup %3124 }
 0x678   :  { %v812_v7 = vadd.f32 1.0, %v3125_v6 }
 0x679   :  { %3126 = vrcp.f32 %v717_v5 }
 0x67a   :  { %3128 = vrcp.f32 %v812_v7 }
 0x683   :  { %v3127_v55 = vpop.eup %3126 }
 0x684   :  { %v3129_v11 = vpop.eup %3128  ;;  %v721_v15 = vmul.f32 %v3127_v55, %v3455_v33 }
 0x685   :  { %v816_v19 = vmul.f32 %v3129_v11, %v3452_v29 }
 0x6e2   :  { %v724_v8 = vpop.permute.xlu0 %723 }
 0x6e3   :  { %v726_v10 = vmul.f32 %v3127_v55, %v724_v8 }
 0x6e5   :  { %728 = vrot.lane.b32.xlu0 %v726_v10, %s3227_s30 }
 0x6e8   :  { %v819_v12 = vpop.permute.xlu1 %818 }
 0x6e9   :  { %v821_v13 = vmul.f32 %v3129_v11, %v819_v12 }
 0x6eb   :  { %823 = vrot.lane.b32.xlu1 %v821_v13, %s3227_s30 }
 0x757   :  { %v729_v17 = vpop.permute.xlu0 %728 }
 0x758   :  { %v3491_v18 = vadd.f32 %v729_v17, %v721_v15 }
 0x75a   :  { %3130 = vtanh.f32 %v3491_v18 }
 0x75d   :  { %v824_v20 = vpop.permute.xlu1 %823 }
 0x75e   :  { %v3495_v21 = vadd.f32 %v824_v20, %v816_v19 }
 0x760   :  { %3132 = vtanh.f32 %v3495_v21 }
 0x764   :  { %v3131_v22 = vpop.eup %3130 }
 0x765   :  { %734 = vrot.lane.b32.xlu0 %v3131_v22, %s3226_s29 }
 0x76a   :  { %v3133_v23 = vpop.eup %3132 }
 0x76b   :  { %829 = vrot.lane.b32.xlu1 %v3133_v23, %s3226_s29 }
 0x7d7   :  { %v735_v24 = vpop.permute.xlu0 %734 }
 0x7d8   :  { %v737_v25 = vmul.f32 %v3127_v55, %v735_v24  ;;  %v163_v24 = vadd.f32 %v3328_v16, %v3419_v57 }
 0x7da   :  { %834 = vrot.lane.b32.xlu0 %v737_v25, %s3227_s30 }
 0x7dd   :  { %v830_v26 = vpop.permute.xlu1 %829 }
 0x7de   :  { %v832_v27 = vmul.f32 %v3129_v11, %v830_v26 }
 0x7e0   :  { %909 = vrot.lane.b32.xlu1 %v832_v27, %s3227_s30 }
 0x84c   :  { %v835_v28 = vpop.permute.xlu0 %834 }
 0x84d   :  { %2742 = vmatmul.mubr.msk.f32.vlgmr.msra.gmra.mrb[8].mxu1 %vm51_vm0, %v835_v28 }
 0x84e   :  { %2995 = vmatpush3.bf16.msra.mxu1 %v3299_v9  ;;  %2763 = vmatprep.mubr.msk.f32.mxu1 %vm3224_vm1, %v3225_v4 }
 0x84f   :  { %2996 = vmatprep.subr.bf16.mxu1 %v3223_v2 }
 0x852   :  { %2998 = vmatpush3.bf16.msra.mxu1 %v3312_v14  ;;  %v910_v29 = vpop.permute.xlu1 %909 }
 0x853   :  { %2753 = vmatmul.mubr.msk.f32.vlgmr.msra.gmra.mrb[14].mxu0 %vm51_vm0, %v910_v29  ;;  %3005 = vmatprep.subr.bf16.mxu1 %v3223_v2 }
 0x854   :  { %3001 = vmatpush3.bf16.msra.mxu0 %v3369_v43  ;;  %2774 = vmatprep.mubr.msk.f32.mxu0 %vm3224_vm1, %v3225_v4 }
 0x855   :  { %2764 = vmatmul.mubr.msk.f32.vlgmr.msra.gmra.mrb[10].mxu1 %vm51_vm0, %v910_v29  ;;  %3002 = vmatprep.subr.bf16.mxu0 %v3223_v2 }
 0x856   :  { %3007 = vmatpush3.bf16.msra.mxu1 %v3357_v39  ;;  %2785 = vmatprep.mubr.msk.f32.mxu1 %vm3224_vm1, %v3225_v4 }
 0x857   :  { %3008 = vmatprep.subr.bf16.mxu1 %v3223_v2 }
 0x858   :  { %3004 = vmatpush3.bf16.msra.mxu0 %v3388_v49 }
 0x859   :  { %3011 = vmatprep.subr.bf16.mxu0 %v3223_v2 }
 0x85a   :  { %3010 = vmatpush3.bf16.msra.mxu1 %v3382_v47 }
 0x85b   :  { %3017 = vmatprep.subr.bf16.mxu1 %v3223_v2 }
 0x920   :  { %v904_v30 = vpop.f32.mrb[8].mxu1 }
 0x921   :  { %v2743_v31 = vpop.f32.mrb[9].mxu1 }
 0x926   :  { %v979_v33 = vpop.f32.mrb[14].mxu0 }
 0x927   :  { %v980_v35 = vadd.f32 %v979_v33, %v904_v30  ;;  %v2754_v36 = vpop.f32.mrb[15].mxu0 }
 0x928   :  { %v1074_v37 = vpop.f32.mrb[10].mxu1 }
 0x929   :  { %v983_v32 = vadd.f32 %v3444_v0, %v980_v35  ;;  %v1078_v38 = vadd.f32 %v1074_v37, %v158_v34  ;;  %v2765_v40 = vpop.f32.mrb[11].mxu1 }
 0x92b   :  { %3134 = vtanh.f32 %v983_v32  ;;  %v2471_v44 = vmul.f32 -1.442695, %v983_v32  ;;  %v2473_v45 = vmul.f32 -1.442695, %v1078_v38 }
 0x92c   :  { %3136 = vtanh.f32 %v1078_v38 }
 0x92d   :  { %3138 = vpow2.f32 %v2471_v44 }
 0x92e   :  { %3140 = vpow2.f32 %v2473_v45 }
 0x935   :  { %v3135_v41 = vpop.eup %3134 }
 0x936   :  { %v3137_v42 = vpop.eup %3136  ;;  %993 = vrot.lane.b32.xlu0 %v3135_v41, %s3226_s29 }
 0x937   :  { %1088 = vrot.lane.b32.xlu1 %v3137_v42, %s3226_s29  ;;  %v3139_v54 = vpop.eup %3138 }
 0x938   :  { %v3141_v46 = vpop.eup %3140  ;;  %v987_v48 = vadd.f32 1.0, %v3139_v54 }
 0x939   :  { %v1082_v50 = vadd.f32 1.0, %v3141_v46 }
 0x93a   :  { %3142 = vrcp.f32 %v987_v48 }
 0x93b   :  { %3144 = vrcp.f32 %v1082_v50 }
 0x944   :  { %v3143_v51 = vpop.eup %3142 }
 0x945   :  { %v3145_v53 = vpop.eup %3144  ;;  %v991_v63 = vmul.f32 %v3143_v51, %v3491_v18 }
 0x946   :  { %v1086_v1 = vmul.f32 %v3145_v53, %v3495_v21 }
 0x9a8   :  { %v994_v52 = vpop.permute.xlu0 %993 }
 0x9a9   :  { %v1089_v60 = vpop.permute.xlu1 %1088  ;;  %v996_v61 = vmul.f32 %v3143_v51, %v994_v52 }
 0x9aa   :  { %v1091_v62 = vmul.f32 %v3145_v53, %v1089_v60 }
 0x9ab   :  { %998 = vrot.lane.b32.xlu0 %v996_v61, %s3227_s30 }
 0x9ac   :  { %1093 = vrot.lane.b32.xlu1 %v1091_v62, %s3227_s30 }
 0xa1d   :  { %v999_v3 = vpop.permute.xlu0 %998 }
 0xa1e   :  { %v1094_v5 = vpop.permute.xlu1 %1093  ;;  %v3532_v6 = vadd.f32 %v999_v3, %v991_v63 }
 0xa1f   :  { %v3534_v7 = vadd.f32 %v1094_v5, %v1086_v1 }
 0xa20   :  { %3146 = vtanh.f32 %v3532_v6 }
 0xa21   :  { %3148 = vtanh.f32 %v3534_v7 }
 0xa2a   :  { %v3147_v55 = vpop.eup %3146 }
 0xa2b   :  { %v3149_v8 = vpop.eup %3148  ;;  %1004 = vrot.lane.b32.xlu0 %v3147_v55, %s3226_s29  ;;  %v168_v55 = vadd.f32 %v3417_v56, %v3328_v16 }
 0xa2c   :  { %1099 = vrot.lane.b32.xlu1 %v3149_v8, %s3226_s29 }
 0xa9d   :  { %v1005_v10 = vpop.permute.xlu0 %1004 }
 0xa9e   :  { %v1100_v11 = vpop.permute.xlu1 %1099  ;;  %v1007_v12 = vmul.f32 %v3143_v51, %v1005_v10 }
 0xa9f   :  { %v1102_v13 = vmul.f32 %v3145_v53, %v1100_v11 }
 0xaa0   :  { %1104 = vrot.lane.b32.xlu0 %v1007_v12, %s3227_s30 }
 0xaa1   :  { %1179 = vrot.lane.b32.xlu1 %v1102_v13, %s3227_s30 }
 0xb12   :  { %v1105_v15 = vpop.permute.xlu0 %1104 }
 0xb13   :  { %v1180_v17 = vpop.permute.xlu1 %1179  ;;  %2775 = vmatmul.mubr.msk.f32.vlgmr.msra.gmra.mrb[16].mxu0 %vm51_vm0, %v1105_v15 }
 0xb14   :  { %2786 = vmatmul.mubr.msk.f32.vlgmr.msra.gmra.mrb[12].mxu1 %vm51_vm0, %v1180_v17  ;;  %3013 = vmatpush3.bf16.msra.mxu0 %v3299_v9 }
 0xb15   :  { %3014 = vmatprep.subr.bf16.mxu0 %v3223_v2  ;;  %2796 = vmatprep.mubr.msk.f32.mxu0 %vm3224_vm1, %v3225_v4 }
 0xb16   :  { %3019 = vmatpush3.bf16.msra.mxu1 %v3369_v43  ;;  %2807 = vmatprep.mubr.msk.f32.mxu1 %vm3224_vm1, %v3225_v4 }
 0xb17   :  { %3020 = vmatprep.subr.bf16.mxu1 %v3223_v2 }
 0xb18   :  { %3016 = vmatpush3.bf16.msra.mxu0 %v3312_v14 }
 0xb19   :  { %3023 = vmatprep.subr.bf16.mxu0 %v3223_v2 }
 0xb1a   :  { %3022 = vmatpush3.bf16.msra.mxu1 %v3388_v49 }
 0xb1b   :  { %2797 = vmatmul.mubr.msk.f32.vlgmr.msra.gmra.mrb[18].mxu0 %vm51_vm0, %v1180_v17  ;;  %3029 = vmatprep.subr.bf16.mxu1 %v3223_v2 }
 0xb1c   :  { %3025 = vmatpush3.bf16.msra.mxu0 %v3357_v39  ;;  %2818 = vmatprep.mubr.msk.f32.mxu0 %vm3224_vm1, %v3225_v4 }
 0xb1d   :  { %3026 = vmatprep.subr.bf16.mxu0 %v3223_v2 }
 0xb20   :  { %3028 = vmatpush3.bf16.msra.mxu0 %v3382_v47 }
 0xb21   :  { %3035 = vmatprep.subr.bf16.mxu0 %v3223_v2 }
 0xbe6   :  { %v1174_v18 = vpop.f32.mrb[16].mxu0 }
 0xbe7   :  { %v1249_v19 = vpop.f32.mrb[12].mxu1  ;;  %v2776_v20 = vpop.f32.mrb[17].mxu0 }
 0xbe8   :  { %v1250_v21 = vadd.f32 %v1249_v19, %v1174_v18  ;;  %v2787_v22 = vpop.f32.mrb[13].mxu1 }
 0xbea   :  { %v1253_v23 = vadd.f32 %v3444_v0, %v1250_v21 }
 0xbec   :  { %3150 = vtanh.f32 %v1253_v23  ;;  %v2476_v30 = vmul.f32 -1.442695, %v1253_v23 }
 0xbee   :  { %v1344_v25 = vpop.f32.mrb[18].mxu0 }
 0xbef   :  { %v1348_v26 = vadd.f32 %v1344_v25, %v163_v24  ;;  %v2798_v27 = vpop.f32.mrb[19].mxu0 }
 0xbf1   :  { %3152 = vtanh.f32 %v1348_v26  ;;  %v2478_v31 = vmul.f32 -1.442695, %v1348_v26 }
 0xbf2   :  { %3154 = vpow2.f32 %v2476_v30 }
 0xbf3   :  { %3156 = vpow2.f32 %v2478_v31 }
 0xbf6   :  { %v3151_v28 = vpop.eup %3150 }
 0xbf7   :  { %1263 = vrot.lane.b32.xlu0 %v3151_v28, %s3226_s29 }
 0xbfb   :  { %v3153_v29 = vpop.eup %3152 }
 0xbfc   :  { %1358 = vrot.lane.b32.xlu1 %v3153_v29, %s3226_s29  ;;  %v3155_v33 = vpop.eup %3154 }
 0xbfd   :  { %v1257_v34 = vadd.f32 1.0, %v3155_v33  ;;  %v3157_v35 = vpop.eup %3156 }
 0xbfe   :  { %v1352_v36 = vadd.f32 1.0, %v3157_v35 }
 0xbff   :  { %3158 = vrcp.f32 %v1257_v34 }
 0xc00   :  { %3160 = vrcp.f32 %v1352_v36 }
 0xc09   :  { %v3159_v57 = vpop.eup %3158 }
 0xc0a   :  { %v3161_v38 = vpop.eup %3160  ;;  %v1261_v42 = vmul.f32 %v3159_v57, %v3532_v6 }
 0xc0b   :  { %v1356_v54 = vmul.f32 %v3161_v38, %v3534_v7 }
 0xc69   :  { %v1264_v37 = vpop.permute.xlu0 %1263 }
 0xc6a   :  { %v1266_v32 = vmul.f32 %v3159_v57, %v1264_v37 }
 0xc6c   :  { %1268 = vrot.lane.b32.xlu0 %v1266_v32, %s3227_s30 }
 0xc6e   :  { %v1359_v40 = vpop.permute.xlu1 %1358 }
 0xc6f   :  { %v1361_v41 = vmul.f32 %v3161_v38, %v1359_v40 }
 0xc71   :  { %1363 = vrot.lane.b32.xlu1 %v1361_v41, %s3227_s30 }
 0xcde   :  { %v1269_v44 = vpop.permute.xlu0 %1268 }
 0xcdf   :  { %v3571_v45 = vadd.f32 %v1269_v44, %v1261_v42 }
 0xce1   :  { %3162 = vtanh.f32 %v3571_v45 }
 0xce3   :  { %v1364_v46 = vpop.permute.xlu1 %1363 }
 0xce4   :  { %v3575_v48 = vadd.f32 %v1364_v46, %v1356_v54 }
 0xce6   :  { %3164 = vtanh.f32 %v3575_v48 }
 0xceb   :  { %v3163_v50 = vpop.eup %3162 }
 0xcec   :  { %1274 = vrot.lane.b32.xlu0 %v3163_v50, %s3226_s29  ;;  %v173_v50 = vadd.f32 %v3328_v16, %v3423_v59 }
 0xcf0   :  { %v3165_v51 = vpop.eup %3164 }
 0xcf1   :  { %1369 = vrot.lane.b32.xlu1 %v3165_v51, %s3226_s29 }
 0xd5e   :  { %v1275_v52 = vpop.permute.xlu0 %1274 }
 0xd5f   :  { %v1277_v53 = vmul.f32 %v3159_v57, %v1275_v52 }
 0xd61   :  { %1374 = vrot.lane.b32.xlu0 %v1277_v53, %s3227_s30 }
 0xd63   :  { %v1370_v60 = vpop.permute.xlu1 %1369 }
 0xd64   :  { %v1372_v61 = vmul.f32 %v3161_v38, %v1370_v60 }
 0xd66   :  { %1449 = vrot.lane.b32.xlu1 %v1372_v61, %s3227_s30 }
 0xdd3   :  { %v1375_v62 = vpop.permute.xlu0 %1374 }
 0xdd4   :  { %2808 = vmatmul.mubr.msk.f32.vlgmr.msra.gmra.mrb[14].mxu1 %vm51_vm0, %v1375_v62 }
 0xdd5   :  { %3031 = vmatpush3.bf16.msra.mxu1 %v3299_v9  ;;  %2829 = vmatprep.mubr.msk.f32.mxu1 %vm3224_vm1, %v3225_v4 }
 0xdd6   :  { %3032 = vmatprep.subr.bf16.mxu1 %v3223_v2 }
 0xdd8   :  { %v1450_v63 = vpop.permute.xlu1 %1449 }
 0xdd9   :  { %3034 = vmatpush3.bf16.msra.mxu1 %v3312_v14  ;;  %2819 = vmatmul.mubr.msk.f32.vlgmr.msra.gmra.mrb[20].mxu0 %vm51_vm0, %v1450_v63 }
 0xdda   :  { %3037 = vmatpush3.bf16.msra.mxu0 %v3369_v43  ;;  %3041 = vmatprep.subr.bf16.mxu1 %v3223_v2 }
 0xddb   :  { %3038 = vmatprep.subr.bf16.mxu0 %v3223_v2  ;;  %2840 = vmatprep.mubr.msk.f32.mxu0 %vm3224_vm1, %v3225_v4 }
 0xddc   :  { %2830 = vmatmul.mubr.msk.f32.vlgmr.msra.gmra.mrb[16].mxu1 %vm51_vm0, %v1450_v63 }
 0xddd   :  { %3043 = vmatpush3.bf16.msra.mxu1 %v3357_v39  ;;  %2851 = vmatprep.mubr.msk.f32.mxu1 %vm3224_vm1, %v3225_v4 }
 0xdde   :  { %3040 = vmatpush3.bf16.msra.mxu0 %v3388_v49  ;;  %3044 = vmatprep.subr.bf16.mxu1 %v3223_v2 }
 0xddf   :  { %3047 = vmatprep.subr.bf16.mxu0 %v3223_v2 }
 0xde1   :  { %3046 = vmatpush3.bf16.msra.mxu1 %v3382_v47 }
 0xde2   :  { %3053 = vmatprep.subr.bf16.mxu1 %v3223_v2 }
 0xea7   :  { %v1444_v1 = vpop.f32.mrb[14].mxu1 }
 0xea8   :  { %v2809_v3 = vpop.f32.mrb[15].mxu1 }
 0xeac   :  { %v1519_v5 = vpop.f32.mrb[20].mxu0 }
 0xead   :  { %v1520_v6 = vadd.f32 %v1519_v5, %v1444_v1  ;;  %v2820_v7 = vpop.f32.mrb[21].mxu0 }
 0xeaf   :  { %v1523_v8 = vadd.f32 %v3444_v0, %v1520_v6  ;;  %v1614_v10 = vpop.f32.mrb[16].mxu1 }
 0xeb0   :  { %v1618_v11 = vadd.f32 %v1614_v10, %v168_v55  ;;  %v2831_v12 = vpop.f32.mrb[17].mxu1 }
 0xeb1   :  { %3166 = vtanh.f32 %v1523_v8  ;;  %v2481_v17 = vmul.f32 -1.442695, %v1523_v8 }
 0xeb2   :  { %3168 = vtanh.f32 %v1618_v11  ;;  %v2483_v18 = vmul.f32 -1.442695, %v1618_v11 }
 0xeb3   :  { %3170 = vpow2.f32 %v2481_v17 }
 0xeb4   :  { %3172 = vpow2.f32 %v2483_v18 }
 0xebb   :  { %v3167_v13 = vpop.eup %3166 }
 0xebc   :  { %v3169_v15 = vpop.eup %3168  ;;  %1533 = vrot.lane.b32.xlu0 %v3167_v13, %s3226_s29 }
 0xebd   :  { %1628 = vrot.lane.b32.xlu1 %v3169_v15, %s3226_s29  ;;  %v3171_v19 = vpop.eup %3170 }
 0xebe   :  { %v3173_v20 = vpop.eup %3172  ;;  %v1527_v56 = vadd.f32 1.0, %v3171_v19 }
 0xebf   :  { %v1622_v21 = vadd.f32 1.0, %v3173_v20 }
 0xec0   :  { %3174 = vrcp.f32 %v1527_v56 }
 0xec1   :  { %3176 = vrcp.f32 %v1622_v21 }
 0xeca   :  { %v3175_v22 = vpop.eup %3174 }
 0xecb   :  { %v3177_v24 = vpop.eup %3176  ;;  %v1531_v28 = vmul.f32 %v3175_v22, %v3571_v45 }
 0xecc   :  { %v1626_v29 = vmul.f32 %v3177_v24, %v3575_v48 }
 0xf2e   :  { %v1534_v23 = vpop.permute.xlu0 %1533 }
 0xf2f   :  { %v1629_v25 = vpop.permute.xlu1 %1628  ;;  %v1536_v26 = vmul.f32 %v3175_v22, %v1534_v23 }
 0xf30   :  { %v1631_v27 = vmul.f32 %v3177_v24, %v1629_v25 }
 0xf31   :  { %1538 = vrot.lane.b32.xlu0 %v1536_v26, %s3227_s30 }
 0xf32   :  { %1633 = vrot.lane.b32.xlu1 %v1631_v27, %s3227_s30 }
 0xfa3   :  { %v1539_v30 = vpop.permute.xlu0 %1538 }
 0xfa4   :  { %v1634_v31 = vpop.permute.xlu1 %1633  ;;  %v3612_v33 = vadd.f32 %v1539_v30, %v1531_v28 }
 0xfa5   :  { %v3614_v34 = vadd.f32 %v1634_v31, %v1626_v29 }
 0xfa6   :  { %3178 = vtanh.f32 %v3612_v33 }
 0xfa7   :  { %3180 = vtanh.f32 %v3614_v34 }
 0xfb0   :  { %v3179_v35 = vpop.eup %3178 }
 0xfb1   :  { %v3181_v36 = vpop.eup %3180  ;;  %1544 = vrot.lane.b32.xlu0 %v3179_v35, %s3226_s29 }
 0xfb2   :  { %1639 = vrot.lane.b32.xlu1 %v3181_v36, %s3226_s29 }
0x1023   :  { %v1545_v57 = vpop.permute.xlu0 %1544 }
0x1024   :  { %v1640_v37 = vpop.permute.xlu1 %1639  ;;  %v1547_v32 = vmul.f32 %v3175_v22, %v1545_v57 }
0x1025   :  { %v1642_v38 = vmul.f32 %v3177_v24, %v1640_v37 }
0x1026   :  { %1644 = vrot.lane.b32.xlu0 %v1547_v32, %s3227_s30 }
0x1027   :  { %1719 = vrot.lane.b32.xlu1 %v1642_v38, %s3227_s30 }
0x1098   :  { %v1645_v40 = vpop.permute.xlu0 %1644 }
0x1099   :  { %v1720_v41 = vpop.permute.xlu1 %1719  ;;  %2841 = vmatmul.mubr.msk.f32.vlgmr.msra.gmra.mrb[22].mxu0 %vm51_vm0, %v1645_v40 }
0x109a   :  { %2852 = vmatmul.mubr.msk.f32.vlgmr.msra.gmra.mrb[18].mxu1 %vm51_vm0, %v1720_v41  ;;  %3049 = vmatpush3.bf16.msra.mxu0 %v3299_v9 }
0x109b   :  { %3050 = vmatprep.subr.bf16.mxu0 %v3223_v2  ;;  %2862 = vmatprep.mubr.msk.f32.mxu0 %vm3224_vm1, %v3225_v4 }
0x109c   :  { %3055 = vmatpush3.bf16.msra.mxu1 %v3369_v43  ;;  %2873 = vmatprep.mubr.msk.f32.mxu1 %vm3224_vm1, %v3225_v4 }
0x109d   :  { %3056 = vmatprep.subr.bf16.mxu1 %v3223_v2 }
0x109e   :  { %3052 = vmatpush3.bf16.msra.mxu0 %v3312_v14 }
0x109f   :  { %3059 = vmatprep.subr.bf16.mxu0 %v3223_v2 }
0x10a0   :  { %3058 = vmatpush3.bf16.msra.mxu1 %v3388_v49 }
0x10a1   :  { %2863 = vmatmul.mubr.msk.f32.vlgmr.msra.gmra.mrb[24].mxu0 %vm51_vm0, %v1720_v41  ;;  %3065 = vmatprep.subr.bf16.mxu1 %v3223_v2 }
0x10a2   :  { %3061 = vmatpush3.bf16.msra.mxu0 %v3357_v39  ;;  %2884 = vmatprep.mubr.msk.f32.mxu0 %vm3224_vm1, %v3225_v4 }
0x10a3   :  { %3062 = vmatprep.subr.bf16.mxu0 %v3223_v2 }
0x10a6   :  { %3064 = vmatpush3.bf16.msra.mxu0 %v3382_v47 }
0x10a7   :  { %3071 = vmatprep.subr.bf16.mxu0 %v3223_v2 }
0x116c   :  { %v1714_v42 = vpop.f32.mrb[22].mxu0 }
0x116d   :  { %v1789_v44 = vpop.f32.mrb[18].mxu1  ;;  %v2842_v45 = vpop.f32.mrb[23].mxu0 }
0x116e   :  { %v1790_v54 = vadd.f32 %v1789_v44, %v1714_v42  ;;  %v2853_v46 = vpop.f32.mrb[19].mxu1 }
0x1170   :  { %v1793_v48 = vadd.f32 %v3444_v0, %v1790_v54 }
0x1172   :  { %3182 = vtanh.f32 %v1793_v48  ;;  %v2486_v62 = vmul.f32 -1.442695, %v1793_v48 }
0x1174   :  { %v1884_v51 = vpop.f32.mrb[24].mxu0 }
0x1175   :  { %v1888_v52 = vadd.f32 %v1884_v51, %v173_v50  ;;  %v2864_v53 = vpop.f32.mrb[25].mxu0 }
0x1177   :  { %3184 = vtanh.f32 %v1888_v52  ;;  %v2488_v63 = vmul.f32 -1.442695, %v1888_v52 }
0x1178   :  { %3186 = vpow2.f32 %v2486_v62 }
0x1179   :  { %3188 = vpow2.f32 %v2488_v63 }
0x117c   :  { %v3183_v60 = vpop.eup %3182 }
0x117d   :  { %1803 = vrot.lane.b32.xlu0 %v3183_v60, %s3226_s29 }
0x1181   :  { %v3185_v61 = vpop.eup %3184 }
0x1182   :  { %1898 = vrot.lane.b32.xlu1 %v3185_v61, %s3226_s29  ;;  %v3187_v1 = vpop.eup %3186 }
0x1183   :  { %v1797_v3 = vadd.f32 1.0, %v3187_v1  ;;  %v3189_v5 = vpop.eup %3188 }
0x1184   :  { %v1892_v6 = vadd.f32 1.0, %v3189_v5 }
0x1185   :  { %3190 = vrcp.f32 %v1797_v3 }
0x1186   :  { %3192 = vrcp.f32 %v1892_v6 }
0x118f   :  { %v3191_v16 = vpop.eup %3190 }
0x1190   :  { %v3193_v55 = vpop.eup %3192  ;;  %v1801_v11 = vmul.f32 %v3191_v16, %v3612_v33 }
0x1191   :  { %v1896_v15 = vmul.f32 %v3193_v55, %v3614_v34 }
0x11ef   :  { %v1804_v59 = vpop.permute.xlu0 %1803 }
0x11f0   :  { %v1806_v7 = vmul.f32 %v3191_v16, %v1804_v59 }
0x11f2   :  { %1808 = vrot.lane.b32.xlu0 %v1806_v7, %s3227_s30 }
0x11f4   :  { %v1899_v8 = vpop.permute.xlu1 %1898 }
0x11f5   :  { %v1901_v10 = vmul.f32 %v3193_v55, %v1899_v8 }
0x11f7   :  { %1903 = vrot.lane.b32.xlu1 %v1901_v10, %s3227_s30 }
0x1264   :  { %v1809_v12 = vpop.permute.xlu0 %1808 }
0x1265   :  { %v3651_v13 = vadd.f32 %v1809_v12, %v1801_v11 }
0x1267   :  { %3194 = vtanh.f32 %v3651_v13 }
0x1269   :  { %v1904_v17 = vpop.permute.xlu1 %1903 }
0x126a   :  { %v3655_v18 = vadd.f32 %v1904_v17, %v1896_v15 }
0x126c   :  { %3196 = vtanh.f32 %v3655_v18 }
0x1271   :  { %v3195_v19 = vpop.eup %3194 }
0x1272   :  { %1814 = vrot.lane.b32.xlu0 %v3195_v19, %s3226_s29 }
0x1276   :  { %v3197_v20 = vpop.eup %3196 }
0x1277   :  { %1909 = vrot.lane.b32.xlu1 %v3197_v20, %s3226_s29  ;;  %v2359_v20 = vld [vmem:[%s3733_s7 + $0x8] sm:$0xff] }
0x12e4   :  { %v1815_v56 = vpop.permute.xlu0 %1814 }
0x12e5   :  { %v1817_v21 = vmul.f32 %v3191_v16, %v1815_v56  ;;  %v2360_v56 = vld [vmem:[%s3733_s7 + $0x10] sm:$0xff] }
0x12e7   :  { %1914 = vrot.lane.b32.xlu0 %v1817_v21, %s3227_s30 }
0x12e9   :  { %v1910_v22 = vpop.permute.xlu1 %1909 }
0x12ea   :  { %v1912_v23 = vmul.f32 %v3193_v55, %v1910_v22  ;;  %v2361_v22 = vld [vmem:[%s3733_s7 + $0x18] sm:$0xff] }
0x12ec   :  { %1989 = vrot.lane.b32.xlu1 %v1912_v23, %s3227_s30  ;;  %v3087_v23 = vpack.c.bf16 %v2361_v22, %v2360_v56 }
0x1359   :  { %v1915_v24 = vpop.permute.xlu0 %1914 }
0x135a   :  { %2874 = vmatmul.mubr.msk.f32.vlgmr.msra.gmra.mrb[20].mxu1 %vm51_vm0, %v1915_v24 }
0x135b   :  { %3067 = vmatpush3.bf16.msra.mxu1 %v3299_v9  ;;  %2895 = vmatprep.mubr.msk.f32.mxu1 %vm3224_vm1, %v3225_v4 }
0x135c   :  { %3068 = vmatprep.subr.bf16.mxu1 %v3223_v2 }
0x135e   :  { %v1990_v25 = vpop.permute.xlu1 %1989 }
0x135f   :  { %3070 = vmatpush3.bf16.msra.mxu1 %v3312_v14  ;;  %2885 = vmatmul.mubr.msk.f32.vlgmr.msra.gmra.mrb[26].mxu0 %vm51_vm0, %v1990_v25 }
0x1360   :  { %3077 = vmatprep.subr.bf16.mxu1 %v3223_v2  ;;  %3073 = vmatpush3.bf16.msra.mxu0 %v3369_v43 }
0x1361   :  { %3074 = vmatprep.subr.bf16.mxu0 %v3223_v2  ;;  %2906 = vmatprep.mubr.msk.f32.mxu0 %vm3224_vm1, %v3225_v4 }
0x1362   :  { %2896 = vmatmul.mubr.msk.f32.vlgmr.msra.gmra.mrb[22].mxu1 %vm51_vm0, %v1990_v25 }
0x1363   :  { %3079 = vmatpush3.bf16.msra.mxu1 %v3357_v39  ;;  %2917 = vmatprep.mubr.msk.f32.mxu1 %vm3224_vm1, %v3225_v4  ;;  %v3222_v39 = vld [vmem:[%s3729_s3] ss:$0 sm:$0xff] }
0x1364   :  { %3080 = vmatprep.subr.bf16.mxu1 %v3223_v2  ;;  %3076 = vmatpush3.bf16.msra.mxu0 %v3388_v49  ;;  %v178_v28 = vadd.f32 %v3222_v39, %v3421_v58 }
0x1365   :  { %3083 = vmatprep.subr.bf16.mxu0 %v3223_v2 }
0x1367   :  { %3082 = vmatpush3.bf16.msra.mxu1 %v3382_v47 }
0x142d   :  { %v1984_v9 = vpop.f32.mrb[20].mxu1 }
0x142e   :  { %v2875_v14 = vpop.f32.mrb[21].mxu1 }
0x1432   :  { %v2059_v43 = vpop.f32.mrb[26].mxu0 }
0x1433   :  { %v2060_v26 = vadd.f32 %v2059_v43, %v1984_v9  ;;  %v2886_v27 = vpop.f32.mrb[27].mxu0  ;;  %v2497_v43 = vld [vmem:[%s3734_s8] ss:$0 sm:$0xff] }
0x1435   :  { %v2063_v29 = vadd.f32 %v3444_v0, %v2060_v26  ;;  %v2154_v30 = vpop.f32.mrb[22].mxu1 }
0x1436   :  { %v2158_v31 = vadd.f32 %v2154_v30, %v178_v28  ;;  %v2897_v49 = vpop.f32.mrb[23].mxu1 }
0x1437   :  { %3198 = vtanh.f32 %v2063_v29  ;;  %v2491_v34 = vmul.f32 -1.442695, %v2063_v29 }
0x1438   :  { %3200 = vtanh.f32 %v2158_v31  ;;  %v2493_v35 = vmul.f32 -1.442695, %v2158_v31 }
0x1439   :  { %3202 = vpow2.f32 %v2491_v34 }
0x143a   :  { %3204 = vpow2.f32 %v2493_v35 }
0x1441   :  { %v3199_v33 = vpop.eup %3198 }
0x1442   :  { %v3201_v47 = vpop.eup %3200  ;;  %2073 = vrot.lane.b32.xlu0 %v3199_v33, %s3226_s29 }
0x1443   :  { %2168 = vrot.lane.b32.xlu1 %v3201_v47, %s3226_s29  ;;  %v3203_v36 = vpop.eup %3202 }
0x1444   :  { %v3205_v57 = vpop.eup %3204  ;;  %v2067_v58 = vadd.f32 1.0, %v3203_v36 }
0x1445   :  { %v2162_v37 = vadd.f32 1.0, %v3205_v57 }
0x1446   :  { %3206 = vrcp.f32 %v2067_v58 }
0x1447   :  { %3208 = vrcp.f32 %v2162_v37 }
0x1450   :  { %v3207_v32 = vpop.eup %3206 }
0x1451   :  { %v3209_v40 = vpop.eup %3208  ;;  %v2071_v45 = vmul.f32 %v3207_v32, %v3651_v13 }
0x1452   :  { %v2166_v54 = vmul.f32 %v3209_v40, %v3655_v18 }
0x14b4   :  { %v2074_v38 = vpop.permute.xlu0 %2073 }
0x14b5   :  { %v2169_v41 = vpop.permute.xlu1 %2168  ;;  %v2076_v42 = vmul.f32 %v3207_v32, %v2074_v38 }
0x14b6   :  { %v2171_v44 = vmul.f32 %v3209_v40, %v2169_v41 }
0x14b7   :  { %2078 = vrot.lane.b32.xlu0 %v2076_v42, %s3227_s30 }
0x14b8   :  { %2173 = vrot.lane.b32.xlu1 %v2171_v44, %s3227_s30 }
0x1529   :  { %v2079_v46 = vpop.permute.xlu0 %2078 }
0x152a   :  { %v2174_v48 = vpop.permute.xlu1 %2173  ;;  %v2081_v50 = vadd.f32 %v2079_v46, %v2071_v45 }
0x152b   :  { %v2176_v51 = vadd.f32 %v2174_v48, %v2166_v54 }
0x152c   :  { %3210 = vtanh.f32 %v2081_v50 }
0x152d   :  { %3212 = vtanh.f32 %v2176_v51 }
0x1536   :  { %v3211_v52 = vpop.eup %3210 }
0x1537   :  { %v3213_v53 = vpop.eup %3212  ;;  %2084 = vrot.lane.b32.xlu0 %v3211_v52, %s3226_s29 }
0x1538   :  { %2179 = vrot.lane.b32.xlu1 %v3213_v53, %s3226_s29 }
0x15a9   :  { %v2085_v60 = vpop.permute.xlu0 %2084 }
0x15aa   :  { %v2180_v61 = vpop.permute.xlu1 %2179  ;;  %v2087_v62 = vmul.f32 %v3207_v32, %v2085_v60 }
0x15ab   :  { %v2182_v63 = vmul.f32 %v3209_v40, %v2180_v61 }
0x15ac   :  { %2184 = vrot.lane.b32.xlu0 %v2087_v62, %s3227_s30 }
0x15ad   :  { %2259 = vrot.lane.b32.xlu1 %v2182_v63, %s3227_s30 }
0x161e   :  { %v2185_v1 = vpop.permute.xlu0 %2184 }
0x161f   :  { %v2260_v3 = vpop.permute.xlu1 %2259  ;;  %2907 = vmatmul.mubr.msk.f32.vlgmr.msra.gmra.mrb[28].mxu0 %vm51_vm0, %v2185_v1 }
0x1620   :  { %2918 = vmatmul.mubr.msk.f32.vlgmr.msra.gmra.mrb[24].mxu1 %vm51_vm0, %v2260_v3  ;;  %2928 = vmatprep.mubr.msk.f32.mxu0 %vm3224_vm1, %v3225_v4 }
0x16f2   :  { %v2254_v5 = vpop.f32.mrb[28].mxu0 }
0x16f3   :  { %v2329_v6 = vpop.f32.mrb[24].mxu1  ;;  %v2908_v16 = vpop.f32.mrb[29].mxu0 }
0x16f4   :  { %v2330_v59 = vadd.f32 %v2329_v6, %v2254_v5  ;;  %v2919_v7 = vpop.f32.mrb[25].mxu1 }
0x16f6   :  { %v2333_v55 = vadd.f32 %v3444_v0, %v2330_v59  ;;  %v2358_v0 = vld [vmem:[%s3733_s7] sm:$0xff] }
0x16f7   :  { %v3084_v21 = vpack.c.bf16 %v2359_v20, %v2358_v0 }
0x16f8   :  { %3214 = vtanh.f32 %v2333_v55  ;;  %v2496_v10 = vmul.f32 -1.442695, %v2333_v55 }
0x16f9   :  { %3085 = vmatpush3.bf16.msra.mxu0 %v3084_v21 }
0x16fa   :  { %3216 = vpow2.f32 %v2496_v10  ;;  %3086 = vmatprep.subr.bf16.mxu0 %v3223_v2 }
0x16fd   :  { %3088 = vmatpush3.bf16.msra.mxu0 %v3087_v23 }
0x1702   :  { %v3215_v8 = vpop.eup %3214 }
0x1703   :  { %2343 = vrot.lane.b32.xlu0 %v3215_v8, %s3226_s29 }
0x1704   :  { %v3217_v11 = vpop.eup %3216 }
0x1705   :  { %v2337_v12 = vadd.f32 1.0, %v3217_v11 }
0x1707   :  { %3218 = vrcp.f32 %v2337_v12 }
0x1711   :  { %v3219_v13 = vpop.eup %3218 }
0x1712   :  { %v2341_v4 = vmul.f32 %v3219_v13, %v2081_v50 }
0x1775   :  { %v2344_v15 = vpop.permute.xlu0 %2343 }
0x1776   :  { %v2346_v17 = vmul.f32 %v3219_v13, %v2344_v15 }
0x1778   :  { %2348 = vrot.lane.b32.xlu1 %v2346_v17, %s3227_s30 }
0x17ea   :  { %v2349_v18 = vpop.permute.xlu1 %2348 }
0x17eb   :  { %v2351_v19 = vadd.f32 %v2349_v18, %v2341_v4 }
0x17ed   :  { %3220 = vtanh.f32 %v2351_v19 }
0x17f7   :  { %v3221_v24 = vpop.eup %3220 }
0x17f8   :  { %2354 = vrot.lane.b32.xlu0 %v3221_v24, %s3226_s29 }
0x186a   :  { %v2355_v25 = vpop.permute.xlu0 %2354 }
0x186b   :  { %v2357_v9 = vmul.f32 %v3219_v13, %v2355_v25 }
0x186d   :  { %2370 = vrot.lane.b32.xlu1 %v2357_v9, %s3227_s30 }
0x18df   :  { %v2371_v14 = vpop.permute.xlu1 %2370 }
0x18e0   :  { %2929 = vmatmul.mubr.msk.f32.vlgmr.msra.gmra.mrb[30].mxu0 %vm51_vm0, %v2371_v14 }
0x19b3   :  { %v2440_v26 = vpop.f32.mrb[30].mxu0 }
0x19b4   :  { %v2441_v27 = vadd.f32 %v2497_v43, %v2440_v26  ;;  %v2930_v39 = vpop.f32.mrb[31].mxu0 }
0x19b6   :  { %2444 = vst [vmem:[%s3735_s9] sm:$0xff] %v2441_v27 }

</bundles_post_ra>
